<compile_context>
chip_gen: v6e
topology: v6e:2x2x1
jax: 0.10.0
libtpu: 0.0.40
codegen_flags: <defaults>
</compile_context>

<pallas_src>
import jax
import jax.numpy as jnp
from jax import lax
from jax.experimental import pallas as pl
from jax.experimental.pallas import tpu as pltpu


# ----------------------------- Pallas kernel -------------------------------


def _encoder_kernel(
    emb_ref,     # (T*Bp, E)   f32  time-major, batch padded to sublane multiple
    len_ref,     # (Bp, 1)     i32
    w_in_ref,    # (E, 6H)     f32  [W_ih_f^T | W_ih_b^T], gate order r|z|n per dir
    b_in_ref,    # (1, 6H)     f32  bih (+ bhh for r,z gates) pre-folded, per dir
    whh_ref,     # (2H, 6H)    f32  block-diag(W_hh_f^T, W_hh_b^T)
    bhh_n_ref,   # (1, 2H)     f32  [bhh_n_f | bhh_n_b]
    wfc_ref,     # (2H, D)     f32  fc weight transposed, fwd rows then bwd rows
    bfc_ref,     # (1, D)      f32
    out_ref,     # (T, Bp, 2H) f32  output (fwd half ++ bwd half)
    hid_ref,     # (Bp, D)     f32  output
    gi_f_ref,    # (T*Bp, 3H)  f32  scratch: precomputed input gates, fwd dir
    gi_b_ref,    # (T*Bp, 3H)  f32  scratch: precomputed input gates, bwd dir
):
    T, Bp, H2 = out_ref.shape
    H = H2 // 2
    lens = len_ref[...]                                   # (Bp, 1) int32

    # ---- hoisted input projection: one big MXU matmul, both directions,
    #      all timesteps, input biases (+ r/z hidden biases) pre-folded. ----
    gi_all = (
        jnp.dot(emb_ref[...], w_in_ref[...], preferred_element_type=jnp.float32)
        + b_in_ref[...]
    )                                                     # (T*Bp, 6H)
    gi_f_ref[...] = gi_all[:, 0:3 * H]
    gi_b_ref[...] = gi_all[:, 3 * H:6 * H]

    whh = whh_ref[...]                                    # (2H, 6H)
    # hoisted sublane broadcasts of the n-gate hidden biases (not CSE'd by JAX)
    bhh_nf = jnp.broadcast_to(bhh_n_ref[:, 0:H], (Bp, H))
    bhh_nb = jnp.broadcast_to(bhh_n_ref[:, H:2 * H], (Bp, H))

    zeros_h = jnp.zeros((Bp, H), jnp.float32)

    def body(i, carry):
        h_f, h_b = carry
        t_f = i
        t_b = T - 1 - i
        row_f = pl.multiple_of(t_f * Bp, Bp)
        row_b = pl.multiple_of(t_b * Bp, Bp)
        gi_f = gi_f_ref[pl.ds(row_f, Bp), :]              # (Bp, 3H)
        gi_b = gi_b_ref[pl.ds(row_b, Bp), :]              # (Bp, 3H)

        # single h-recurrence matmul for BOTH directions (block-diagonal whh)
        h_cat = jnp.concatenate([h_f, h_b], axis=1)                      # (Bp, 2H)
        gh = jnp.dot(h_cat, whh, preferred_element_type=jnp.float32)     # (Bp, 6H)
        gh_f = gh[:, 0:3 * H]
        gh_b = gh[:, 3 * H:6 * H]

        # PyTorch GRU cell, gate order (r, z, n); bih/bhh_r/bhh_z already in gi.
        r_f = jax.nn.sigmoid(gi_f[:, 0:H] + gh_f[:, 0:H])
        z_f = jax.nn.sigmoid(gi_f[:, H:2 * H] + gh_f[:, H:2 * H])
        n_f = jnp.tanh(gi_f[:, 2 * H:3 * H] + r_f * (gh_f[:, 2 * H:3 * H] + bhh_nf))
        hf_new = (1.0 - z_f) * n_f + z_f * h_f

        r_b = jax.nn.sigmoid(gi_b[:, 0:H] + gh_b[:, 0:H])
        z_b = jax.nn.sigmoid(gi_b[:, H:2 * H] + gh_b[:, H:2 * H])
        n_b = jnp.tanh(gi_b[:, 2 * H:3 * H] + r_b * (gh_b[:, 2 * H:3 * H] + bhh_nb))
        hb_new = (1.0 - z_b) * n_b + z_b * h_b

        # packed-sequence semantics: zero-pad outputs, freeze h past src_len
        valid_f = lens > t_f                              # (Bp, 1) bool
        valid_b = lens > t_b
        out_ref[t_f, :, 0:H] = jnp.where(valid_f, hf_new, 0.0)
        out_ref[t_b, :, H:2 * H] = jnp.where(valid_b, hb_new, 0.0)

        return (jnp.where(valid_f, hf_new, h_f),
                jnp.where(valid_b, hb_new, h_b))

    h_f, h_b = lax.fori_loop(0, T, body, (zeros_h, zeros_h), unroll=True)

    # ---- hidden = tanh(fc(cat(h_fwd, h_bwd))) : one fused matmul -----------
    h_cat = jnp.concatenate([h_f, h_b], axis=1)                          # (Bp, 2H)
    hid_ref[...] = jnp.tanh(
        jnp.dot(h_cat, wfc_ref[...], preferred_element_type=jnp.float32)
        + bfc_ref[...]
    )


# ------------------------------ wrapper -------------------------------------


def _fold_params(params, H):
    """Stack fwd/bwd weights and pre-fold biases for the kernel layout."""
    wih_f, wih_b = params["wih_f"], params["wih_b"]
    whh_f, whh_b = params["whh_f"], params["whh_b"]
    bih_f, bih_b = params["bih_f"], params["bih_b"]
    bhh_f, bhh_b = params["bhh_f"], params["bhh_b"]

    w_in = jnp.concatenate([wih_f, wih_b], axis=1)                      # (E, 6H)

    def fold_bias(bih, bhh):
        # r and z gates: bih + bhh can be folded (added outside any product);
        # n gate: keep only bih here (bhh_n sits inside r * (.)).
        return jnp.concatenate(
            [bih[:, 0:2 * H] + bhh[:, 0:2 * H], bih[:, 2 * H:3 * H]], axis=1)

    b_in = jnp.concatenate([fold_bias(bih_f, bhh_f), fold_bias(bih_b, bhh_b)],
                           axis=1)                                      # (1, 6H)
    bhh_n = jnp.concatenate([bhh_f[:, 2 * H:], bhh_b[:, 2 * H:]], axis=1)  # (1, 2H)

    whh_bd = jnp.zeros((2 * H, 6 * H), jnp.float32)
    whh_bd = whh_bd.at[0:H, 0:3 * H].set(whh_f)
    whh_bd = whh_bd.at[H:2 * H, 3 * H:6 * H].set(whh_b)                 # (2H, 6H)

    wfc = jnp.concatenate([params["wfc_f"], params["wfc_b"]], axis=0)   # (2H, D)
    return w_in, b_in, whh_bd, bhh_n, wfc, params["bfc"]


@jax.jit
def encoder_forward(src, src_len, params):
    """src: (T, B) int32, src_len: (B,) int32 (sorted descending)."""
    T, B = src.shape
    emb_table = params["embedding"]
    E = emb_table.shape[1]
    H = params["whh_f"].shape[0]
    D = params["wfc_f"].shape[1]

    # pad batch to the f32 sublane tile (8) so all loads/stores are tile-aligned
    Bp = ((B + 7) // 8) * 8

    # Embedding lookup + (eval-mode) dropout = identity  -- plain-JAX glue.
    # TODO(synk): fuse the gather into the kernel via scalar-prefetched token ids.
    embedded = jnp.take(emb_table, src, axis=0).astype(jnp.float32)     # (T, B, E)
    lens = src_len.astype(jnp.int32)
    if Bp != B:
        embedded = jnp.pad(embedded, ((0, 0), (0, Bp - B), (0, 0)))
        lens = jnp.pad(lens, (0, Bp - B))                               # len 0 -> inert rows
    emb2d = embedded.reshape(T * Bp, E)                                 # free (contiguous)
    lens2d = lens.reshape(Bp, 1)

    w_in, b_in, whh_bd, bhh_n, wfc, bfc = _fold_params(params, H)

    # size the scoped-VMEM limit from the resident buffers (whole-array design)
    f32 = 4
    resident = f32 * (
        T * Bp * E                      # embedded
        + 2 * T * Bp * 3 * H            # gi scratches
        + T * Bp * 2 * H                # output
        + Bp * (D + 1)                  # hidden + lens
        + E * 6 * H + 2 * H * 6 * H + 2 * H * D + 8 * H + D   # params
    )
    vmem_limit = int(min(64 * 1024 * 1024, max(16 * 1024 * 1024, 2 * resident)))

    vmem = pl.BlockSpec(memory_space=pltpu.MemorySpace.VMEM)

    out_full, hid_full = pl.pallas_call(
        _encoder_kernel,
        out_shape=(
            jax.ShapeDtypeStruct((T, Bp, 2 * H), jnp.float32),
            jax.ShapeDtypeStruct((Bp, D), jnp.float32),
        ),
        in_specs=[vmem] * 8,
        out_specs=(vmem, vmem),
        scratch_shapes=[
            pltpu.VMEM((T * Bp, 3 * H), jnp.float32),
            pltpu.VMEM((T * Bp, 3 * H), jnp.float32),
        ],
        compiler_params=pltpu.CompilerParams(vmem_limit_bytes=vmem_limit),
    )(emb2d, lens2d, w_in, b_in, whh_bd, bhh_n, wfc, bfc)

    return out_full[:, :B, :], hid_full[:B]


# --------------------------- pure-JAX reference ------------------------------


def encoder_reference(src, src_len, params):
    T, B = src.shape
    H = params["whh_f"].shape[0]
    emb = jnp.take(params["embedding"], src, axis=0).astype(jnp.float32)
    lens = src_len.astype(jnp.int32).reshape(B, 1)

    def cell(x, h, wih, whh, bih, bhh):
        gi = x @ wih + bih
        gh = h @ whh + bhh
        r = jax.nn.sigmoid(gi[:, 0:H] + gh[:, 0:H])
        z = jax.nn.sigmoid(gi[:, H:2 * H] + gh[:, H:2 * H])
        n = jnp.tanh(gi[:, 2 * H:3 * H] + r * gh[:, 2 * H:3 * H])
        return (1.0 - z) * n + z * h

    def run(direction):
        wih = params[f"wih_{direction}"]
        whh = params[f"whh_{direction}"]
        bih = params[f"bih_{direction}"]
        bhh = params[f"bhh_{direction}"]
        ts = range(T) if direction == "f" else range(T - 1, -1, -1)
        h = jnp.zeros((B, H), jnp.float32)
        outs = [None] * T
        for t in ts:
            h_new = cell(emb[t], h, wih, whh, bih, bhh)
            valid = lens > t
            outs[t] = jnp.where(valid, h_new, 0.0)
            h = jnp.where(valid, h_new, h)
        return jnp.stack(outs, axis=0), h

    out_f, h_f = run("f")
    out_b, h_b = run("b")
    outputs = jnp.concatenate([out_f, out_b], axis=-1)
    hidden = jnp.tanh(h_f @ params["wfc_f"] + h_b @ params["wfc_b"] + params["bfc"])
    return outputs, hidden


# --------------------------------- main --------------------------------------


if __name__ == "__main__":
    INPUT_DIM = 20      # vocab size
    EMB_DIM = 32
    ENC_HID_DIM = 32
    DEC_HID_DIM = 32
    T, B = 8, 4

    key = jax.random.PRNGKey(0)
    keys = jax.random.split(key, 16)
    s = 0.1

    params = {
        "embedding": jax.random.normal(keys[0], (INPUT_DIM, EMB_DIM), jnp.float32) * s,
        # forward direction GRU (W_ih^T, W_hh^T; gate order r|z|n)
        "wih_f": jax.random.normal(keys[1], (EMB_DIM, 3 * ENC_HID_DIM), jnp.float32) * s,
        "whh_f": jax.random.normal(keys[2], (ENC_HID_DIM, 3 * ENC_HID_DIM), jnp.float32) * s,
        "bih_f": jax.random.normal(keys[3], (1, 3 * ENC_HID_DIM), jnp.float32) * s,
        "bhh_f": jax.random.normal(keys[4], (1, 3 * ENC_HID_DIM), jnp.float32) * s,
        # backward direction GRU
        "wih_b": jax.random.normal(keys[5], (EMB_DIM, 3 * ENC_HID_DIM), jnp.float32) * s,
        "whh_b": jax.random.normal(keys[6], (ENC_HID_DIM, 3 * ENC_HID_DIM), jnp.float32) * s,
        "bih_b": jax.random.normal(keys[7], (1, 3 * ENC_HID_DIM), jnp.float32) * s,
        "bhh_b": jax.random.normal(keys[8], (1, 3 * ENC_HID_DIM), jnp.float32) * s,
        # fc: Linear(2H -> D), split into forward-half / backward-half (transposed)
        "wfc_f": jax.random.normal(keys[9], (ENC_HID_DIM, DEC_HID_DIM), jnp.float32) * s,
        "wfc_b": jax.random.normal(keys[10], (ENC_HID_DIM, DEC_HID_DIM), jnp.float32) * s,
        "bfc": jax.random.normal(keys[11], (1, DEC_HID_DIM), jnp.float32) * s,
    }

    src = jax.random.randint(keys[12], (T, B), 0, INPUT_DIM, dtype=jnp.int32)
    src_len = jnp.array([8, 7, 5, 3], dtype=jnp.int32)   # sorted descending, max == T

    outputs, hidden = encoder_forward(src, src_len, params)
    jax.block_until_ready((outputs, hidden))

    ref_outputs, ref_hidden = encoder_reference(src, src_len, params)
    assert outputs.shape == (T, B, 2 * ENC_HID_DIM)
    assert hidden.shape == (B, DEC_HID_DIM)
    assert jnp.allclose(outputs, ref_outputs, atol=1e-5, rtol=1e-5)
    assert jnp.allclose(hidden, ref_hidden, atol=1e-5, rtol=1e-5)

    print("KERNEL_OK")
</pallas_src>

<mosaic_0001>
module attributes {stable_mosaic.version = 11 : i64} {
  func.func @_encoder_kernel(%arg0: memref<64x32xf32, #tpu.memory_space<vmem>>, %arg1: memref<8x1xi32, #tpu.memory_space<vmem>>, %arg2: memref<32x192xf32, #tpu.memory_space<vmem>>, %arg3: memref<1x192xf32, #tpu.memory_space<vmem>>, %arg4: memref<64x192xf32, #tpu.memory_space<vmem>>, %arg5: memref<1x64xf32, #tpu.memory_space<vmem>>, %arg6: memref<64x32xf32, #tpu.memory_space<vmem>>, %arg7: memref<1x32xf32, #tpu.memory_space<vmem>>, %arg8: memref<8x8x64xf32, #tpu.memory_space<vmem>>, %arg9: memref<8x32xf32, #tpu.memory_space<vmem>>, %arg10: memref<64x96xf32, #tpu.memory_space<vmem>>, %arg11: memref<64x96xf32, #tpu.memory_space<vmem>>) attributes {dimension_semantics = [], scalar_prefetch = 0 : i64, scratch_operands = 2 : i64, tpu.core_type = #tpu.core_type<tc>} {
    %c0 = arith.constant 0 : index
    %c0_0 = arith.constant 0 : index
    %0 = vector.load %arg1[%c0, %c0_0] : memref<8x1xi32, #tpu.memory_space<vmem>>, vector<8x1xi32>
    %c0_1 = arith.constant 0 : index
    %c0_2 = arith.constant 0 : index
    %1 = vector.load %arg0[%c0_1, %c0_2] : memref<64x32xf32, #tpu.memory_space<vmem>>, vector<64x32xf32>
    %c0_3 = arith.constant 0 : index
    %c0_4 = arith.constant 0 : index
    %2 = vector.load %arg2[%c0_3, %c0_4] : memref<32x192xf32, #tpu.memory_space<vmem>>, vector<32x192xf32>
    %cst = arith.constant dense<0.000000e+00> : vector<64x192xf32>
    %3 = tpu.matmul %1, %2, %cst {dimension_numbers = #tpu.dot_dimension_numbers<[1], [0], [0], [1], [0, 0, 1, 1], [], []>} : vector<64x32xf32>, vector<32x192xf32>, vector<64x192xf32> -> vector<64x192xf32>
    %c0_5 = arith.constant 0 : index
    %c0_6 = arith.constant 0 : index
    %4 = vector.load %arg3[%c0_5, %c0_6] : memref<1x192xf32, #tpu.memory_space<vmem>>, vector<1x192xf32>
    %5 = vector.broadcast %4 : vector<1x192xf32> to vector<64x192xf32>
    %6 = arith.addf %3, %5 : vector<64x192xf32>
    %7 = vector.extract_strided_slice %6 {offsets = [0, 0], sizes = [64, 96], strides = [1, 1]} : vector<64x192xf32> to vector<64x96xf32>
    %c0_7 = arith.constant 0 : index
    %c0_8 = arith.constant 0 : index
    %8 = vector.load %arg10[%c0_7, %c0_8] : memref<64x96xf32, #tpu.memory_space<vmem>>, vector<64x96xf32>
    tpu.vector_store %arg10[%c0_7, %c0_8], %7 {strides = array<i32>} : memref<64x96xf32, #tpu.memory_space<vmem>>, vector<64x96xf32>,
    %9 = vector.extract_strided_slice %6 {offsets = [0, 96], sizes = [64, 96], strides = [1, 1]} : vector<64x192xf32> to vector<64x96xf32>
    %c0_9 = arith.constant 0 : index
    %c0_10 = arith.constant 0 : index
    %10 = vector.load %arg11[%c0_9, %c0_10] : memref<64x96xf32, #tpu.memory_space<vmem>>, vector<64x96xf32>
    tpu.vector_store %arg11[%c0_9, %c0_10], %9 {strides = array<i32>} : memref<64x96xf32, #tpu.memory_space<vmem>>, vector<64x96xf32>,
    %c0_11 = arith.constant 0 : index
    %c0_12 = arith.constant 0 : index
    %11 = vector.load %arg4[%c0_11, %c0_12] : memref<64x192xf32, #tpu.memory_space<vmem>>, vector<64x192xf32>
    %c0_13 = arith.constant 0 : index
    %c0_14 = arith.constant 0 : index
    %12 = vector.load %arg5[%c0_13, %c0_14] : memref<1x64xf32, #tpu.memory_space<vmem>>, vector<1x32xf32>
    %13 = vector.shape_cast %12 : vector<1x32xf32> to vector<1x32xf32>
    %14 = vector.broadcast %13 : vector<1x32xf32> to vector<8x32xf32>
    %c0_15 = arith.constant 0 : index
    %c32 = arith.constant 32 : index
    %15 = vector.load %arg5[%c0_15, %c32] : memref<1x64xf32, #tpu.memory_space<vmem>>, vector<1x32xf32>
    %16 = vector.shape_cast %15 : vector<1x32xf32> to vector<1x32xf32>
    %17 = vector.broadcast %16 : vector<1x32xf32> to vector<8x32xf32>
    %cst_16 = arith.constant 0.000000e+00 : f32
    %18 = vector.broadcast %cst_16 : f32 to vector<8x32xf32>
    %c0_i32 = arith.constant 0 : i32
    %c7_i32 = arith.constant 7 : i32
    %19 = arith.subi %c7_i32, %c0_i32 : i32
    %c8_i32 = arith.constant 8 : i32
    %20 = arith.muli %c0_i32, %c8_i32 : i32
    %21 = tpu.assume_multiple %20, 8 : i32
    %c8_i32_17 = arith.constant 8 : i32
    %22 = arith.muli %19, %c8_i32_17 : i32
    %23 = tpu.assume_multiple %22, 8 : i32
    %24 = arith.index_cast %21 : i32 to index
    %c0_18 = arith.constant 0 : index
    %25 = vector.load %arg10[%24, %c0_18] : memref<64x96xf32, #tpu.memory_space<vmem>>, vector<8x96xf32>
    %26 = arith.index_cast %23 : i32 to index
    %c0_19 = arith.constant 0 : index
    %27 = vector.load %arg11[%26, %c0_19] : memref<64x96xf32, #tpu.memory_space<vmem>>, vector<8x96xf32>
    %28 = tpu.concatenate %18, %18 in 1 : vector<8x32xf32>, vector<8x32xf32> -> vector<8x64xf32>
    %cst_20 = arith.constant dense<0.000000e+00> : vector<8x192xf32>
    %29 = tpu.matmul %28, %11, %cst_20 {dimension_numbers = #tpu.dot_dimension_numbers<[1], [0], [0], [1], [0, 0, 1, 1], [], []>} : vector<8x64xf32>, vector<64x192xf32>, vector<8x192xf32> -> vector<8x192xf32>
    %30 = vector.extract_strided_slice %29 {offsets = [0, 0], sizes = [8, 96], strides = [1, 1]} : vector<8x192xf32> to vector<8x96xf32>
    %31 = vector.extract_strided_slice %29 {offsets = [0, 96], sizes = [8, 96], strides = [1, 1]} : vector<8x192xf32> to vector<8x96xf32>
    %32 = vector.extract_strided_slice %25 {offsets = [0, 0], sizes = [8, 32], strides = [1, 1]} : vector<8x96xf32> to vector<8x32xf32>
    %33 = vector.extract_strided_slice %30 {offsets = [0, 0], sizes = [8, 32], strides = [1, 1]} : vector<8x96xf32> to vector<8x32xf32>
    %34 = arith.addf %32, %33 : vector<8x32xf32>
    %35 = arith.negf %34 : vector<8x32xf32>
    %36 = math.exp %35 : vector<8x32xf32>
    %cst_21 = arith.constant 1.000000e+00 : f32
    %37 = vector.broadcast %cst_21 : f32 to vector<8x32xf32>
    %38 = arith.addf %37, %36 : vector<8x32xf32>
    %39 = arith.divf %37, %38 : vector<8x32xf32>
    %40 = vector.extract_strided_slice %25 {offsets = [0, 32], sizes = [8, 32], strides = [1, 1]} : vector<8x96xf32> to vector<8x32xf32>
    %41 = vector.extract_strided_slice %30 {offsets = [0, 32], sizes = [8, 32], strides = [1, 1]} : vector<8x96xf32> to vector<8x32xf32>
    %42 = arith.addf %40, %41 : vector<8x32xf32>
    %43 = arith.negf %42 : vector<8x32xf32>
    %44 = math.exp %43 : vector<8x32xf32>
    %cst_22 = arith.constant 1.000000e+00 : f32
    %45 = vector.broadcast %cst_22 : f32 to vector<8x32xf32>
    %46 = arith.addf %45, %44 : vector<8x32xf32>
    %47 = arith.divf %45, %46 : vector<8x32xf32>
    %48 = vector.extract_strided_slice %25 {offsets = [0, 64], sizes = [8, 32], strides = [1, 1]} : vector<8x96xf32> to vector<8x32xf32>
    %49 = vector.extract_strided_slice %30 {offsets = [0, 64], sizes = [8, 32], strides = [1, 1]} : vector<8x96xf32> to vector<8x32xf32>
    %50 = arith.addf %49, %14 : vector<8x32xf32>
    %51 = arith.mulf %39, %50 : vector<8x32xf32>
    %52 = arith.addf %48, %51 : vector<8x32xf32>
    %53 = math.tanh %52 : vector<8x32xf32>
    %cst_23 = arith.constant 1.000000e+00 : f32
    %54 = vector.broadcast %cst_23 : f32 to vector<8x32xf32>
    %55 = arith.subf %54, %47 : vector<8x32xf32>
    %56 = arith.mulf %55, %53 : vector<8x32xf32>
    %57 = arith.mulf %47, %18 : vector<8x32xf32>
    %58 = arith.addf %56, %57 : vector<8x32xf32>
    %59 = vector.extract_strided_slice %27 {offsets = [0, 0], sizes = [8, 32], strides = [1, 1]} : vector<8x96xf32> to vector<8x32xf32>
    %60 = vector.extract_strided_slice %31 {offsets = [0, 0], sizes = [8, 32], strides = [1, 1]} : vector<8x96xf32> to vector<8x32xf32>
    %61 = arith.addf %59, %60 : vector<8x32xf32>
    %62 = arith.negf %61 : vector<8x32xf32>
    %63 = math.exp %62 : vector<8x32xf32>
    %cst_24 = arith.constant 1.000000e+00 : f32
    %64 = vector.broadcast %cst_24 : f32 to vector<8x32xf32>
    %65 = arith.addf %64, %63 : vector<8x32xf32>
    %66 = arith.divf %64, %65 : vector<8x32xf32>
    %67 = vector.extract_strided_slice %27 {offsets = [0, 32], sizes = [8, 32], strides = [1, 1]} : vector<8x96xf32> to vector<8x32xf32>
    %68 = vector.extract_strided_slice %31 {offsets = [0, 32], sizes = [8, 32], strides = [1, 1]} : vector<8x96xf32> to vector<8x32xf32>
    %69 = arith.addf %67, %68 : vector<8x32xf32>
    %70 = arith.negf %69 : vector<8x32xf32>
    %71 = math.exp %70 : vector<8x32xf32>
    %cst_25 = arith.constant 1.000000e+00 : f32
    %72 = vector.broadcast %cst_25 : f32 to vector<8x32xf32>
    %73 = arith.addf %72, %71 : vector<8x32xf32>
    %74 = arith.divf %72, %73 : vector<8x32xf32>
    %75 = vector.extract_strided_slice %27 {offsets = [0, 64], sizes = [8, 32], strides = [1, 1]} : vector<8x96xf32> to vector<8x32xf32>
    %76 = vector.extract_strided_slice %31 {offsets = [0, 64], sizes = [8, 32], strides = [1, 1]} : vector<8x96xf32> to vector<8x32xf32>
    %77 = arith.addf %76, %17 : vector<8x32xf32>
    %78 = arith.mulf %66, %77 : vector<8x32xf32>
    %79 = arith.addf %75, %78 : vector<8x32xf32>
    %80 = math.tanh %79 : vector<8x32xf32>
    %cst_26 = arith.constant 1.000000e+00 : f32
    %81 = vector.broadcast %cst_26 : f32 to vector<8x32xf32>
    %82 = arith.subf %81, %74 : vector<8x32xf32>
    %83 = arith.mulf %82, %80 : vector<8x32xf32>
    %84 = arith.mulf %74, %18 : vector<8x32xf32>
    %85 = arith.addf %83, %84 : vector<8x32xf32>
    %86 = vector.broadcast %c0_i32 : i32 to vector<8x1xi32>
    %87 = arith.cmpi sgt, %0, %86 : vector<8x1xi32>
    %88 = vector.broadcast %19 : i32 to vector<8x1xi32>
    %89 = arith.cmpi sgt, %0, %88 : vector<8x1xi32>
    %cst_27 = arith.constant 0.000000e+00 : f32
    %90 = vector.shape_cast %87 : vector<8x1xi1> to vector<8x1xi1>
    %91 = vector.broadcast %90 : vector<8x1xi1> to vector<8x32xi1>
    %92 = vector.broadcast %cst_27 : f32 to vector<8x32xf32>
    %93 = arith.select %91, %58, %92 : vector<8x32xi1>, vector<8x32xf32>
    %94 = arith.index_cast %c0_i32 : i32 to index
    %c0_28 = arith.constant 0 : index
    %c0_29 = arith.constant 0 : index
    %95 = vector.load %arg8[%94, %c0_28, %c0_29] : memref<8x8x64xf32, #tpu.memory_space<vmem>>, vector<1x8x32xf32>
    %96 = vector.shape_cast %95 : vector<1x8x32xf32> to vector<8x32xf32>
    %97 = vector.shape_cast %93 : vector<8x32xf32> to vector<1x8x32xf32>
    tpu.vector_store %arg8[%94, %c0_28, %c0_29], %97 {strides = array<i32>} : memref<8x8x64xf32, #tpu.memory_space<vmem>>, vector<1x8x32xf32>,
    %cst_30 = arith.constant 0.000000e+00 : f32
    %98 = vector.shape_cast %89 : vector<8x1xi1> to vector<8x1xi1>
    %99 = vector.broadcast %98 : vector<8x1xi1> to vector<8x32xi1>
    %100 = vector.broadcast %cst_30 : f32 to vector<8x32xf32>
    %101 = arith.select %99, %85, %100 : vector<8x32xi1>, vector<8x32xf32>
    %102 = arith.index_cast %19 : i32 to index
    %c0_31 = arith.constant 0 : index
    %c32_32 = arith.constant 32 : index
    %103 = vector.load %arg8[%102, %c0_31, %c32_32] : memref<8x8x64xf32, #tpu.memory_space<vmem>>, vector<1x8x32xf32>
    %104 = vector.shape_cast %103 : vector<1x8x32xf32> to vector<8x32xf32>
    %105 = vector.shape_cast %101 : vector<8x32xf32> to vector<1x8x32xf32>
    tpu.vector_store %arg8[%102, %c0_31, %c32_32], %105 {strides = array<i32>} : memref<8x8x64xf32, #tpu.memory_space<vmem>>, vector<1x8x32xf32>,
    %106 = vector.shape_cast %87 : vector<8x1xi1> to vector<8x1xi1>
    %107 = vector.broadcast %106 : vector<8x1xi1> to vector<8x32xi1>
    %108 = arith.select %107, %58, %18 : vector<8x32xi1>, vector<8x32xf32>
    %109 = vector.shape_cast %89 : vector<8x1xi1> to vector<8x1xi1>
    %110 = vector.broadcast %109 : vector<8x1xi1> to vector<8x32xi1>
    %111 = arith.select %110, %85, %18 : vector<8x32xi1>, vector<8x32xf32>
    %c1_i32 = arith.constant 1 : i32
    %c7_i32_33 = arith.constant 7 : i32
    %112 = arith.subi %c7_i32_33, %c1_i32 : i32
    %c8_i32_34 = arith.constant 8 : i32
    %113 = arith.muli %c1_i32, %c8_i32_34 : i32
    %114 = tpu.assume_multiple %113, 8 : i32
    %c8_i32_35 = arith.constant 8 : i32
    %115 = arith.muli %112, %c8_i32_35 : i32
    %116 = tpu.assume_multiple %115, 8 : i32
    %117 = arith.index_cast %114 : i32 to index
    %c0_36 = arith.constant 0 : index
    %118 = vector.load %arg10[%117, %c0_36] : memref<64x96xf32, #tpu.memory_space<vmem>>, vector<8x96xf32>
    %119 = arith.index_cast %116 : i32 to index
    %c0_37 = arith.constant 0 : index
    %120 = vector.load %arg11[%119, %c0_37] : memref<64x96xf32, #tpu.memory_space<vmem>>, vector<8x96xf32>
    %121 = tpu.concatenate %108, %111 in 1 : vector<8x32xf32>, vector<8x32xf32> -> vector<8x64xf32>
    %cst_38 = arith.constant dense<0.000000e+00> : vector<8x192xf32>
    %122 = tpu.matmul %121, %11, %cst_38 {dimension_numbers = #tpu.dot_dimension_numbers<[1], [0], [0], [1], [0, 0, 1, 1], [], []>} : vector<8x64xf32>, vector<64x192xf32>, vector<8x192xf32> -> vector<8x192xf32>
    %123 = vector.extract_strided_slice %122 {offsets = [0, 0], sizes = [8, 96], strides = [1, 1]} : vector<8x192xf32> to vector<8x96xf32>
    %124 = vector.extract_strided_slice %122 {offsets = [0, 96], sizes = [8, 96], strides = [1, 1]} : vector<8x192xf32> to vector<8x96xf32>
    %125 = vector.extract_strided_slice %118 {offsets = [0, 0], sizes = [8, 32], strides = [1, 1]} : vector<8x96xf32> to vector<8x32xf32>
    %126 = vector.extract_strided_slice %123 {offsets = [0, 0], sizes = [8, 32], strides = [1, 1]} : vector<8x96xf32> to vector<8x32xf32>
    %127 = arith.addf %125, %126 : vector<8x32xf32>
    %128 = arith.negf %127 : vector<8x32xf32>
    %129 = math.exp %128 : vector<8x32xf32>
    %cst_39 = arith.constant 1.000000e+00 : f32
    %130 = vector.broadcast %cst_39 : f32 to vector<8x32xf32>
    %131 = arith.addf %130, %129 : vector<8x32xf32>
    %132 = arith.divf %130, %131 : vector<8x32xf32>
    %133 = vector.extract_strided_slice %118 {offsets = [0, 32], sizes = [8, 32], strides = [1, 1]} : vector<8x96xf32> to vector<8x32xf32>
    %134 = vector.extract_strided_slice %123 {offsets = [0, 32], sizes = [8, 32], strides = [1, 1]} : vector<8x96xf32> to vector<8x32xf32>
    %135 = arith.addf %133, %134 : vector<8x32xf32>
    %136 = arith.negf %135 : vector<8x32xf32>
    %137 = math.exp %136 : vector<8x32xf32>
    %cst_40 = arith.constant 1.000000e+00 : f32
    %138 = vector.broadcast %cst_40 : f32 to vector<8x32xf32>
    %139 = arith.addf %138, %137 : vector<8x32xf32>
    %140 = arith.divf %138, %139 : vector<8x32xf32>
    %141 = vector.extract_strided_slice %118 {offsets = [0, 64], sizes = [8, 32], strides = [1, 1]} : vector<8x96xf32> to vector<8x32xf32>
    %142 = vector.extract_strided_slice %123 {offsets = [0, 64], sizes = [8, 32], strides = [1, 1]} : vector<8x96xf32> to vector<8x32xf32>
    %143 = arith.addf %142, %14 : vector<8x32xf32>
    %144 = arith.mulf %132, %143 : vector<8x32xf32>
    %145 = arith.addf %141, %144 : vector<8x32xf32>
    %146 = math.tanh %145 : vector<8x32xf32>
    %cst_41 = arith.constant 1.000000e+00 : f32
    %147 = vector.broadcast %cst_41 : f32 to vector<8x32xf32>
    %148 = arith.subf %147, %140 : vector<8x32xf32>
    %149 = arith.mulf %148, %146 : vector<8x32xf32>
    %150 = arith.mulf %140, %108 : vector<8x32xf32>
    %151 = arith.addf %149, %150 : vector<8x32xf32>
    %152 = vector.extract_strided_slice %120 {offsets = [0, 0], sizes = [8, 32], strides = [1, 1]} : vector<8x96xf32> to vector<8x32xf32>
    %153 = vector.extract_strided_slice %124 {offsets = [0, 0], sizes = [8, 32], strides = [1, 1]} : vector<8x96xf32> to vector<8x32xf32>
    %154 = arith.addf %152, %153 : vector<8x32xf32>
    %155 = arith.negf %154 : vector<8x32xf32>
    %156 = math.exp %155 : vector<8x32xf32>
    %cst_42 = arith.constant 1.000000e+00 : f32
    %157 = vector.broadcast %cst_42 : f32 to vector<8x32xf32>
    %158 = arith.addf %157, %156 : vector<8x32xf32>
    %159 = arith.divf %157, %158 : vector<8x32xf32>
    %160 = vector.extract_strided_slice %120 {offsets = [0, 32], sizes = [8, 32], strides = [1, 1]} : vector<8x96xf32> to vector<8x32xf32>
    %161 = vector.extract_strided_slice %124 {offsets = [0, 32], sizes = [8, 32], strides = [1, 1]} : vector<8x96xf32> to vector<8x32xf32>
    %162 = arith.addf %160, %161 : vector<8x32xf32>
    %163 = arith.negf %162 : vector<8x32xf32>
    %164 = math.exp %163 : vector<8x32xf32>
    %cst_43 = arith.constant 1.000000e+00 : f32
    %165 = vector.broadcast %cst_43 : f32 to vector<8x32xf32>
    %166 = arith.addf %165, %164 : vector<8x32xf32>
    %167 = arith.divf %165, %166 : vector<8x32xf32>
    %168 = vector.extract_strided_slice %120 {offsets = [0, 64], sizes = [8, 32], strides = [1, 1]} : vector<8x96xf32> to vector<8x32xf32>
    %169 = vector.extract_strided_slice %124 {offsets = [0, 64], sizes = [8, 32], strides = [1, 1]} : vector<8x96xf32> to vector<8x32xf32>
    %170 = arith.addf %169, %17 : vector<8x32xf32>
    %171 = arith.mulf %159, %170 : vector<8x32xf32>
    %172 = arith.addf %168, %171 : vector<8x32xf32>
    %173 = math.tanh %172 : vector<8x32xf32>
    %cst_44 = arith.constant 1.000000e+00 : f32
    %174 = vector.broadcast %cst_44 : f32 to vector<8x32xf32>
    %175 = arith.subf %174, %167 : vector<8x32xf32>
    %176 = arith.mulf %175, %173 : vector<8x32xf32>
    %177 = arith.mulf %167, %111 : vector<8x32xf32>
    %178 = arith.addf %176, %177 : vector<8x32xf32>
    %179 = vector.broadcast %c1_i32 : i32 to vector<8x1xi32>
    %180 = arith.cmpi sgt, %0, %179 : vector<8x1xi32>
    %181 = vector.broadcast %112 : i32 to vector<8x1xi32>
    %182 = arith.cmpi sgt, %0, %181 : vector<8x1xi32>
    %cst_45 = arith.constant 0.000000e+00 : f32
    %183 = vector.shape_cast %180 : vector<8x1xi1> to vector<8x1xi1>
    %184 = vector.broadcast %183 : vector<8x1xi1> to vector<8x32xi1>
    %185 = vector.broadcast %cst_45 : f32 to vector<8x32xf32>
    %186 = arith.select %184, %151, %185 : vector<8x32xi1>, vector<8x32xf32>
    %187 = arith.index_cast %c1_i32 : i32 to index
    %c0_46 = arith.constant 0 : index
    %c0_47 = arith.constant 0 : index
    %188 = vector.load %arg8[%187, %c0_46, %c0_47] : memref<8x8x64xf32, #tpu.memory_space<vmem>>, vector<1x8x32xf32>
    %189 = vector.shape_cast %188 : vector<1x8x32xf32> to vector<8x32xf32>
    %190 = vector.shape_cast %186 : vector<8x32xf32> to vector<1x8x32xf32>
    tpu.vector_store %arg8[%187, %c0_46, %c0_47], %190 {strides = array<i32>} : memref<8x8x64xf32, #tpu.memory_space<vmem>>, vector<1x8x32xf32>,
    %cst_48 = arith.constant 0.000000e+00 : f32
    %191 = vector.shape_cast %182 : vector<8x1xi1> to vector<8x1xi1>
    %192 = vector.broadcast %191 : vector<8x1xi1> to vector<8x32xi1>
    %193 = vector.broadcast %cst_48 : f32 to vector<8x32xf32>
    %194 = arith.select %192, %178, %193 : vector<8x32xi1>, vector<8x32xf32>
    %195 = arith.index_cast %112 : i32 to index
    %c0_49 = arith.constant 0 : index
    %c32_50 = arith.constant 32 : index
    %196 = vector.load %arg8[%195, %c0_49, %c32_50] : memref<8x8x64xf32, #tpu.memory_space<vmem>>, vector<1x8x32xf32>
    %197 = vector.shape_cast %196 : vector<1x8x32xf32> to vector<8x32xf32>
    %198 = vector.shape_cast %194 : vector<8x32xf32> to vector<1x8x32xf32>
    tpu.vector_store %arg8[%195, %c0_49, %c32_50], %198 {strides = array<i32>} : memref<8x8x64xf32, #tpu.memory_space<vmem>>, vector<1x8x32xf32>,
    %199 = vector.shape_cast %180 : vector<8x1xi1> to vector<8x1xi1>
    %200 = vector.broadcast %199 : vector<8x1xi1> to vector<8x32xi1>
    %201 = arith.select %200, %151, %108 : vector<8x32xi1>, vector<8x32xf32>
    %202 = vector.shape_cast %182 : vector<8x1xi1> to vector<8x1xi1>
    %203 = vector.broadcast %202 : vector<8x1xi1> to vector<8x32xi1>
    %204 = arith.select %203, %178, %111 : vector<8x32xi1>, vector<8x32xf32>
    %c2_i32 = arith.constant 2 : i32
    %c7_i32_51 = arith.constant 7 : i32
    %205 = arith.subi %c7_i32_51, %c2_i32 : i32
    %c8_i32_52 = arith.constant 8 : i32
    %206 = arith.muli %c2_i32, %c8_i32_52 : i32
    %207 = tpu.assume_multiple %206, 8 : i32
    %c8_i32_53 = arith.constant 8 : i32
    %208 = arith.muli %205, %c8_i32_53 : i32
    %209 = tpu.assume_multiple %208, 8 : i32
    %210 = arith.index_cast %207 : i32 to index
    %c0_54 = arith.constant 0 : index
    %211 = vector.load %arg10[%210, %c0_54] : memref<64x96xf32, #tpu.memory_space<vmem>>, vector<8x96xf32>
    %212 = arith.index_cast %209 : i32 to index
    %c0_55 = arith.constant 0 : index
    %213 = vector.load %arg11[%212, %c0_55] : memref<64x96xf32, #tpu.memory_space<vmem>>, vector<8x96xf32>
    %214 = tpu.concatenate %201, %204 in 1 : vector<8x32xf32>, vector<8x32xf32> -> vector<8x64xf32>
    %cst_56 = arith.constant dense<0.000000e+00> : vector<8x192xf32>
    %215 = tpu.matmul %214, %11, %cst_56 {dimension_numbers = #tpu.dot_dimension_numbers<[1], [0], [0], [1], [0, 0, 1, 1], [], []>} : vector<8x64xf32>, vector<64x192xf32>, vector<8x192xf32> -> vector<8x192xf32>
    %216 = vector.extract_strided_slice %215 {offsets = [0, 0], sizes = [8, 96], strides = [1, 1]} : vector<8x192xf32> to vector<8x96xf32>
    %217 = vector.extract_strided_slice %215 {offsets = [0, 96], sizes = [8, 96], strides = [1, 1]} : vector<8x192xf32> to vector<8x96xf32>
    %218 = vector.extract_strided_slice %211 {offsets = [0, 0], sizes = [8, 32], strides = [1, 1]} : vector<8x96xf32> to vector<8x32xf32>
    %219 = vector.extract_strided_slice %216 {offsets = [0, 0], sizes = [8, 32], strides = [1, 1]} : vector<8x96xf32> to vector<8x32xf32>
    %220 = arith.addf %218, %219 : vector<8x32xf32>
    %221 = arith.negf %220 : vector<8x32xf32>
    %222 = math.exp %221 : vector<8x32xf32>
    %cst_57 = arith.constant 1.000000e+00 : f32
    %223 = vector.broadcast %cst_57 : f32 to vector<8x32xf32>
    %224 = arith.addf %223, %222 : vector<8x32xf32>
    %225 = arith.divf %223, %224 : vector<8x32xf32>
    %226 = vector.extract_strided_slice %211 {offsets = [0, 32], sizes = [8, 32], strides = [1, 1]} : vector<8x96xf32> to vector<8x32xf32>
    %227 = vector.extract_strided_slice %216 {offsets = [0, 32], sizes = [8, 32], strides = [1, 1]} : vector<8x96xf32> to vector<8x32xf32>
    %228 = arith.addf %226, %227 : vector<8x32xf32>
    %229 = arith.negf %228 : vector<8x32xf32>
    %230 = math.exp %229 : vector<8x32xf32>
    %cst_58 = arith.constant 1.000000e+00 : f32
    %231 = vector.broadcast %cst_58 : f32 to vector<8x32xf32>
    %232 = arith.addf %231, %230 : vector<8x32xf32>
    %233 = arith.divf %231, %232 : vector<8x32xf32>
    %234 = vector.extract_strided_slice %211 {offsets = [0, 64], sizes = [8, 32], strides = [1, 1]} : vector<8x96xf32> to vector<8x32xf32>
    %235 = vector.extract_strided_slice %216 {offsets = [0, 64], sizes = [8, 32], strides = [1, 1]} : vector<8x96xf32> to vector<8x32xf32>
    %236 = arith.addf %235, %14 : vector<8x32xf32>
    %237 = arith.mulf %225, %236 : vector<8x32xf32>
    %238 = arith.addf %234, %237 : vector<8x32xf32>
    %239 = math.tanh %238 : vector<8x32xf32>
    %cst_59 = arith.constant 1.000000e+00 : f32
    %240 = vector.broadcast %cst_59 : f32 to vector<8x32xf32>
    %241 = arith.subf %240, %233 : vector<8x32xf32>
    %242 = arith.mulf %241, %239 : vector<8x32xf32>
    %243 = arith.mulf %233, %201 : vector<8x32xf32>
    %244 = arith.addf %242, %243 : vector<8x32xf32>
    %245 = vector.extract_strided_slice %213 {offsets = [0, 0], sizes = [8, 32], strides = [1, 1]} : vector<8x96xf32> to vector<8x32xf32>
    %246 = vector.extract_strided_slice %217 {offsets = [0, 0], sizes = [8, 32], strides = [1, 1]} : vector<8x96xf32> to vector<8x32xf32>
    %247 = arith.addf %245, %246 : vector<8x32xf32>
    %248 = arith.negf %247 : vector<8x32xf32>
    %249 = math.exp %248 : vector<8x32xf32>
    %cst_60 = arith.constant 1.000000e+00 : f32
    %250 = vector.broadcast %cst_60 : f32 to vector<8x32xf32>
    %251 = arith.addf %250, %249 : vector<8x32xf32>
    %252 = arith.divf %250, %251 : vector<8x32xf32>
    %253 = vector.extract_strided_slice %213 {offsets = [0, 32], sizes = [8, 32], strides = [1, 1]} : vector<8x96xf32> to vector<8x32xf32>
    %254 = vector.extract_strided_slice %217 {offsets = [0, 32], sizes = [8, 32], strides = [1, 1]} : vector<8x96xf32> to vector<8x32xf32>
    %255 = arith.addf %253, %254 : vector<8x32xf32>
    %256 = arith.negf %255 : vector<8x32xf32>
    %257 = math.exp %256 : vector<8x32xf32>
    %cst_61 = arith.constant 1.000000e+00 : f32
    %258 = vector.broadcast %cst_61 : f32 to vector<8x32xf32>
    %259 = arith.addf %258, %257 : vector<8x32xf32>
    %260 = arith.divf %258, %259 : vector<8x32xf32>
    %261 = vector.extract_strided_slice %213 {offsets = [0, 64], sizes = [8, 32], strides = [1, 1]} : vector<8x96xf32> to vector<8x32xf32>
    %262 = vector.extract_strided_slice %217 {offsets = [0, 64], sizes = [8, 32], strides = [1, 1]} : vector<8x96xf32> to vector<8x32xf32>
    %263 = arith.addf %262, %17 : vector<8x32xf32>
    %264 = arith.mulf %252, %263 : vector<8x32xf32>
    %265 = arith.addf %261, %264 : vector<8x32xf32>
    %266 = math.tanh %265 : vector<8x32xf32>
    %cst_62 = arith.constant 1.000000e+00 : f32
    %267 = vector.broadcast %cst_62 : f32 to vector<8x32xf32>
    %268 = arith.subf %267, %260 : vector<8x32xf32>
    %269 = arith.mulf %268, %266 : vector<8x32xf32>
    %270 = arith.mulf %260, %204 : vector<8x32xf32>
    %271 = arith.addf %269, %270 : vector<8x32xf32>
    %272 = vector.broadcast %c2_i32 : i32 to vector<8x1xi32>
    %273 = arith.cmpi sgt, %0, %272 : vector<8x1xi32>
    %274 = vector.broadcast %205 : i32 to vector<8x1xi32>
    %275 = arith.cmpi sgt, %0, %274 : vector<8x1xi32>
    %cst_63 = arith.constant 0.000000e+00 : f32
    %276 = vector.shape_cast %273 : vector<8x1xi1> to vector<8x1xi1>
    %277 = vector.broadcast %276 : vector<8x1xi1> to vector<8x32xi1>
    %278 = vector.broadcast %cst_63 : f32 to vector<8x32xf32>
    %279 = arith.select %277, %244, %278 : vector<8x32xi1>, vector<8x32xf32>
    %280 = arith.index_cast %c2_i32 : i32 to index
    %c0_64 = arith.constant 0 : index
    %c0_65 = arith.constant 0 : index
    %281 = vector.load %arg8[%280, %c0_64, %c0_65] : memref<8x8x64xf32, #tpu.memory_space<vmem>>, vector<1x8x32xf32>
    %282 = vector.shape_cast %281 : vector<1x8x32xf32> to vector<8x32xf32>
    %283 = vector.shape_cast %279 : vector<8x32xf32> to vector<1x8x32xf32>
    tpu.vector_store %arg8[%280, %c0_64, %c0_65], %283 {strides = array<i32>} : memref<8x8x64xf32, #tpu.memory_space<vmem>>, vector<1x8x32xf32>,
    %cst_66 = arith.constant 0.000000e+00 : f32
    %284 = vector.shape_cast %275 : vector<8x1xi1> to vector<8x1xi1>
    %285 = vector.broadcast %284 : vector<8x1xi1> to vector<8x32xi1>
    %286 = vector.broadcast %cst_66 : f32 to vector<8x32xf32>
    %287 = arith.select %285, %271, %286 : vector<8x32xi1>, vector<8x32xf32>
    %288 = arith.index_cast %205 : i32 to index
    %c0_67 = arith.constant 0 : index
    %c32_68 = arith.constant 32 : index
    %289 = vector.load %arg8[%288, %c0_67, %c32_68] : memref<8x8x64xf32, #tpu.memory_space<vmem>>, vector<1x8x32xf32>
    %290 = vector.shape_cast %289 : vector<1x8x32xf32> to vector<8x32xf32>
    %291 = vector.shape_cast %287 : vector<8x32xf32> to vector<1x8x32xf32>
    tpu.vector_store %arg8[%288, %c0_67, %c32_68], %291 {strides = array<i32>} : memref<8x8x64xf32, #tpu.memory_space<vmem>>, vector<1x8x32xf32>,
    %292 = vector.shape_cast %273 : vector<8x1xi1> to vector<8x1xi1>
    %293 = vector.broadcast %292 : vector<8x1xi1> to vector<8x32xi1>
    %294 = arith.select %293, %244, %201 : vector<8x32xi1>, vector<8x32xf32>
    %295 = vector.shape_cast %275 : vector<8x1xi1> to vector<8x1xi1>
    %296 = vector.broadcast %295 : vector<8x1xi1> to vector<8x32xi1>
    %297 = arith.select %296, %271, %204 : vector<8x32xi1>, vector<8x32xf32>
    %c3_i32 = arith.constant 3 : i32
    %c7_i32_69 = arith.constant 7 : i32
    %298 = arith.subi %c7_i32_69, %c3_i32 : i32
    %c8_i32_70 = arith.constant 8 : i32
    %299 = arith.muli %c3_i32, %c8_i32_70 : i32
    %300 = tpu.assume_multiple %299, 8 : i32
    %c8_i32_71 = arith.constant 8 : i32
    %301 = arith.muli %298, %c8_i32_71 : i32
    %302 = tpu.assume_multiple %301, 8 : i32
    %303 = arith.index_cast %300 : i32 to index
    %c0_72 = arith.constant 0 : index
    %304 = vector.load %arg10[%303, %c0_72] : memref<64x96xf32, #tpu.memory_space<vmem>>, vector<8x96xf32>
    %305 = arith.index_cast %302 : i32 to index
    %c0_73 = arith.constant 0 : index
    %306 = vector.load %arg11[%305, %c0_73] : memref<64x96xf32, #tpu.memory_space<vmem>>, vector<8x96xf32>
    %307 = tpu.concatenate %294, %297 in 1 : vector<8x32xf32>, vector<8x32xf32> -> vector<8x64xf32>
    %cst_74 = arith.constant dense<0.000000e+00> : vector<8x192xf32>
    %308 = tpu.matmul %307, %11, %cst_74 {dimension_numbers = #tpu.dot_dimension_numbers<[1], [0], [0], [1], [0, 0, 1, 1], [], []>} : vector<8x64xf32>, vector<64x192xf32>, vector<8x192xf32> -> vector<8x192xf32>
    %309 = vector.extract_strided_slice %308 {offsets = [0, 0], sizes = [8, 96], strides = [1, 1]} : vector<8x192xf32> to vector<8x96xf32>
    %310 = vector.extract_strided_slice %308 {offsets = [0, 96], sizes = [8, 96], strides = [1, 1]} : vector<8x192xf32> to vector<8x96xf32>
    %311 = vector.extract_strided_slice %304 {offsets = [0, 0], sizes = [8, 32], strides = [1, 1]} : vector<8x96xf32> to vector<8x32xf32>
    %312 = vector.extract_strided_slice %309 {offsets = [0, 0], sizes = [8, 32], strides = [1, 1]} : vector<8x96xf32> to vector<8x32xf32>
    %313 = arith.addf %311, %312 : vector<8x32xf32>
    %314 = arith.negf %313 : vector<8x32xf32>
    %315 = math.exp %314 : vector<8x32xf32>
    %cst_75 = arith.constant 1.000000e+00 : f32
    %316 = vector.broadcast %cst_75 : f32 to vector<8x32xf32>
    %317 = arith.addf %316, %315 : vector<8x32xf32>
    %318 = arith.divf %316, %317 : vector<8x32xf32>
    %319 = vector.extract_strided_slice %304 {offsets = [0, 32], sizes = [8, 32], strides = [1, 1]} : vector<8x96xf32> to vector<8x32xf32>
    %320 = vector.extract_strided_slice %309 {offsets = [0, 32], sizes = [8, 32], strides = [1, 1]} : vector<8x96xf32> to vector<8x32xf32>
    %321 = arith.addf %319, %320 : vector<8x32xf32>
    %322 = arith.negf %321 : vector<8x32xf32>
    %323 = math.exp %322 : vector<8x32xf32>
    %cst_76 = arith.constant 1.000000e+00 : f32
    %324 = vector.broadcast %cst_76 : f32 to vector<8x32xf32>
    %325 = arith.addf %324, %323 : vector<8x32xf32>
    %326 = arith.divf %324, %325 : vector<8x32xf32>
    %327 = vector.extract_strided_slice %304 {offsets = [0, 64], sizes = [8, 32], strides = [1, 1]} : vector<8x96xf32> to vector<8x32xf32>
    %328 = vector.extract_strided_slice %309 {offsets = [0, 64], sizes = [8, 32], strides = [1, 1]} : vector<8x96xf32> to vector<8x32xf32>
    %329 = arith.addf %328, %14 : vector<8x32xf32>
    %330 = arith.mulf %318, %329 : vector<8x32xf32>
    %331 = arith.addf %327, %330 : vector<8x32xf32>
    %332 = math.tanh %331 : vector<8x32xf32>
    %cst_77 = arith.constant 1.000000e+00 : f32
    %333 = vector.broadcast %cst_77 : f32 to vector<8x32xf32>
    %334 = arith.subf %333, %326 : vector<8x32xf32>
    %335 = arith.mulf %334, %332 : vector<8x32xf32>
    %336 = arith.mulf %326, %294 : vector<8x32xf32>
    %337 = arith.addf %335, %336 : vector<8x32xf32>
    %338 = vector.extract_strided_slice %306 {offsets = [0, 0], sizes = [8, 32], strides = [1, 1]} : vector<8x96xf32> to vector<8x32xf32>
    %339 = vector.extract_strided_slice %310 {offsets = [0, 0], sizes = [8, 32], strides = [1, 1]} : vector<8x96xf32> to vector<8x32xf32>
    %340 = arith.addf %338, %339 : vector<8x32xf32>
    %341 = arith.negf %340 : vector<8x32xf32>
    %342 = math.exp %341 : vector<8x32xf32>
    %cst_78 = arith.constant 1.000000e+00 : f32
    %343 = vector.broadcast %cst_78 : f32 to vector<8x32xf32>
    %344 = arith.addf %343, %342 : vector<8x32xf32>
    %345 = arith.divf %343, %344 : vector<8x32xf32>
    %346 = vector.extract_strided_slice %306 {offsets = [0, 32], sizes = [8, 32], strides = [1, 1]} : vector<8x96xf32> to vector<8x32xf32>
    %347 = vector.extract_strided_slice %310 {offsets = [0, 32], sizes = [8, 32], strides = [1, 1]} : vector<8x96xf32> to vector<8x32xf32>
    %348 = arith.addf %346, %347 : vector<8x32xf32>
    %349 = arith.negf %348 : vector<8x32xf32>
    %350 = math.exp %349 : vector<8x32xf32>
    %cst_79 = arith.constant 1.000000e+00 : f32
    %351 = vector.broadcast %cst_79 : f32 to vector<8x32xf32>
    %352 = arith.addf %351, %350 : vector<8x32xf32>
    %353 = arith.divf %351, %352 : vector<8x32xf32>
    %354 = vector.extract_strided_slice %306 {offsets = [0, 64], sizes = [8, 32], strides = [1, 1]} : vector<8x96xf32> to vector<8x32xf32>
    %355 = vector.extract_strided_slice %310 {offsets = [0, 64], sizes = [8, 32], strides = [1, 1]} : vector<8x96xf32> to vector<8x32xf32>
    %356 = arith.addf %355, %17 : vector<8x32xf32>
    %357 = arith.mulf %345, %356 : vector<8x32xf32>
    %358 = arith.addf %354, %357 : vector<8x32xf32>
    %359 = math.tanh %358 : vector<8x32xf32>
    %cst_80 = arith.constant 1.000000e+00 : f32
    %360 = vector.broadcast %cst_80 : f32 to vector<8x32xf32>
    %361 = arith.subf %360, %353 : vector<8x32xf32>
    %362 = arith.mulf %361, %359 : vector<8x32xf32>
    %363 = arith.mulf %353, %297 : vector<8x32xf32>
    %364 = arith.addf %362, %363 : vector<8x32xf32>
    %365 = vector.broadcast %c3_i32 : i32 to vector<8x1xi32>
    %366 = arith.cmpi sgt, %0, %365 : vector<8x1xi32>
    %367 = vector.broadcast %298 : i32 to vector<8x1xi32>
    %368 = arith.cmpi sgt, %0, %367 : vector<8x1xi32>
    %cst_81 = arith.constant 0.000000e+00 : f32
    %369 = vector.shape_cast %366 : vector<8x1xi1> to vector<8x1xi1>
    %370 = vector.broadcast %369 : vector<8x1xi1> to vector<8x32xi1>
    %371 = vector.broadcast %cst_81 : f32 to vector<8x32xf32>
    %372 = arith.select %370, %337, %371 : vector<8x32xi1>, vector<8x32xf32>
    %373 = arith.index_cast %c3_i32 : i32 to index
    %c0_82 = arith.constant 0 : index
    %c0_83 = arith.constant 0 : index
    %374 = vector.load %arg8[%373, %c0_82, %c0_83] : memref<8x8x64xf32, #tpu.memory_space<vmem>>, vector<1x8x32xf32>
    %375 = vector.shape_cast %374 : vector<1x8x32xf32> to vector<8x32xf32>
    %376 = vector.shape_cast %372 : vector<8x32xf32> to vector<1x8x32xf32>
    tpu.vector_store %arg8[%373, %c0_82, %c0_83], %376 {strides = array<i32>} : memref<8x8x64xf32, #tpu.memory_space<vmem>>, vector<1x8x32xf32>,
    %cst_84 = arith.constant 0.000000e+00 : f32
    %377 = vector.shape_cast %368 : vector<8x1xi1> to vector<8x1xi1>
    %378 = vector.broadcast %377 : vector<8x1xi1> to vector<8x32xi1>
    %379 = vector.broadcast %cst_84 : f32 to vector<8x32xf32>
    %380 = arith.select %378, %364, %379 : vector<8x32xi1>, vector<8x32xf32>
    %381 = arith.index_cast %298 : i32 to index
    %c0_85 = arith.constant 0 : index
    %c32_86 = arith.constant 32 : index
    %382 = vector.load %arg8[%381, %c0_85, %c32_86] : memref<8x8x64xf32, #tpu.memory_space<vmem>>, vector<1x8x32xf32>
    %383 = vector.shape_cast %382 : vector<1x8x32xf32> to vector<8x32xf32>
    %384 = vector.shape_cast %380 : vector<8x32xf32> to vector<1x8x32xf32>
    tpu.vector_store %arg8[%381, %c0_85, %c32_86], %384 {strides = array<i32>} : memref<8x8x64xf32, #tpu.memory_space<vmem>>, vector<1x8x32xf32>,
    %385 = vector.shape_cast %366 : vector<8x1xi1> to vector<8x1xi1>
    %386 = vector.broadcast %385 : vector<8x1xi1> to vector<8x32xi1>
    %387 = arith.select %386, %337, %294 : vector<8x32xi1>, vector<8x32xf32>
    %388 = vector.shape_cast %368 : vector<8x1xi1> to vector<8x1xi1>
    %389 = vector.broadcast %388 : vector<8x1xi1> to vector<8x32xi1>
    %390 = arith.select %389, %364, %297 : vector<8x32xi1>, vector<8x32xf32>
    %c4_i32 = arith.constant 4 : i32
    %c7_i32_87 = arith.constant 7 : i32
    %391 = arith.subi %c7_i32_87, %c4_i32 : i32
    %c8_i32_88 = arith.constant 8 : i32
    %392 = arith.muli %c4_i32, %c8_i32_88 : i32
    %393 = tpu.assume_multiple %392, 8 : i32
    %c8_i32_89 = arith.constant 8 : i32
    %394 = arith.muli %391, %c8_i32_89 : i32
    %395 = tpu.assume_multiple %394, 8 : i32
    %396 = arith.index_cast %393 : i32 to index
    %c0_90 = arith.constant 0 : index
    %397 = vector.load %arg10[%396, %c0_90] : memref<64x96xf32, #tpu.memory_space<vmem>>, vector<8x96xf32>
    %398 = arith.index_cast %395 : i32 to index
    %c0_91 = arith.constant 0 : index
    %399 = vector.load %arg11[%398, %c0_91] : memref<64x96xf32, #tpu.memory_space<vmem>>, vector<8x96xf32>
    %400 = tpu.concatenate %387, %390 in 1 : vector<8x32xf32>, vector<8x32xf32> -> vector<8x64xf32>
    %cst_92 = arith.constant dense<0.000000e+00> : vector<8x192xf32>
    %401 = tpu.matmul %400, %11, %cst_92 {dimension_numbers = #tpu.dot_dimension_numbers<[1], [0], [0], [1], [0, 0, 1, 1], [], []>} : vector<8x64xf32>, vector<64x192xf32>, vector<8x192xf32> -> vector<8x192xf32>
    %402 = vector.extract_strided_slice %401 {offsets = [0, 0], sizes = [8, 96], strides = [1, 1]} : vector<8x192xf32> to vector<8x96xf32>
    %403 = vector.extract_strided_slice %401 {offsets = [0, 96], sizes = [8, 96], strides = [1, 1]} : vector<8x192xf32> to vector<8x96xf32>
    %404 = vector.extract_strided_slice %397 {offsets = [0, 0], sizes = [8, 32], strides = [1, 1]} : vector<8x96xf32> to vector<8x32xf32>
    %405 = vector.extract_strided_slice %402 {offsets = [0, 0], sizes = [8, 32], strides = [1, 1]} : vector<8x96xf32> to vector<8x32xf32>
    %406 = arith.addf %404, %405 : vector<8x32xf32>
    %407 = arith.negf %406 : vector<8x32xf32>
    %408 = math.exp %407 : vector<8x32xf32>
    %cst_93 = arith.constant 1.000000e+00 : f32
    %409 = vector.broadcast %cst_93 : f32 to vector<8x32xf32>
    %410 = arith.addf %409, %408 : vector<8x32xf32>
    %411 = arith.divf %409, %410 : vector<8x32xf32>
    %412 = vector.extract_strided_slice %397 {offsets = [0, 32], sizes = [8, 32], strides = [1, 1]} : vector<8x96xf32> to vector<8x32xf32>
    %413 = vector.extract_strided_slice %402 {offsets = [0, 32], sizes = [8, 32], strides = [1, 1]} : vector<8x96xf32> to vector<8x32xf32>
    %414 = arith.addf %412, %413 : vector<8x32xf32>
    %415 = arith.negf %414 : vector<8x32xf32>
    %416 = math.exp %415 : vector<8x32xf32>
    %cst_94 = arith.constant 1.000000e+00 : f32
    %417 = vector.broadcast %cst_94 : f32 to vector<8x32xf32>
    %418 = arith.addf %417, %416 : vector<8x32xf32>
    %419 = arith.divf %417, %418 : vector<8x32xf32>
    %420 = vector.extract_strided_slice %397 {offsets = [0, 64], sizes = [8, 32], strides = [1, 1]} : vector<8x96xf32> to vector<8x32xf32>
    %421 = vector.extract_strided_slice %402 {offsets = [0, 64], sizes = [8, 32], strides = [1, 1]} : vector<8x96xf32> to vector<8x32xf32>
    %422 = arith.addf %421, %14 : vector<8x32xf32>
    %423 = arith.mulf %411, %422 : vector<8x32xf32>
    %424 = arith.addf %420, %423 : vector<8x32xf32>
    %425 = math.tanh %424 : vector<8x32xf32>
    %cst_95 = arith.constant 1.000000e+00 : f32
    %426 = vector.broadcast %cst_95 : f32 to vector<8x32xf32>
    %427 = arith.subf %426, %419 : vector<8x32xf32>
    %428 = arith.mulf %427, %425 : vector<8x32xf32>
    %429 = arith.mulf %419, %387 : vector<8x32xf32>
    %430 = arith.addf %428, %429 : vector<8x32xf32>
    %431 = vector.extract_strided_slice %399 {offsets = [0, 0], sizes = [8, 32], strides = [1, 1]} : vector<8x96xf32> to vector<8x32xf32>
    %432 = vector.extract_strided_slice %403 {offsets = [0, 0], sizes = [8, 32], strides = [1, 1]} : vector<8x96xf32> to vector<8x32xf32>
    %433 = arith.addf %431, %432 : vector<8x32xf32>
    %434 = arith.negf %433 : vector<8x32xf32>
    %435 = math.exp %434 : vector<8x32xf32>
    %cst_96 = arith.constant 1.000000e+00 : f32
    %436 = vector.broadcast %cst_96 : f32 to vector<8x32xf32>
    %437 = arith.addf %436, %435 : vector<8x32xf32>
    %438 = arith.divf %436, %437 : vector<8x32xf32>
    %439 = vector.extract_strided_slice %399 {offsets = [0, 32], sizes = [8, 32], strides = [1, 1]} : vector<8x96xf32> to vector<8x32xf32>
    %440 = vector.extract_strided_slice %403 {offsets = [0, 32], sizes = [8, 32], strides = [1, 1]} : vector<8x96xf32> to vector<8x32xf32>
    %441 = arith.addf %439, %440 : vector<8x32xf32>
    %442 = arith.negf %441 : vector<8x32xf32>
    %443 = math.exp %442 : vector<8x32xf32>
    %cst_97 = arith.constant 1.000000e+00 : f32
    %444 = vector.broadcast %cst_97 : f32 to vector<8x32xf32>
    %445 = arith.addf %444, %443 : vector<8x32xf32>
    %446 = arith.divf %444, %445 : vector<8x32xf32>
    %447 = vector.extract_strided_slice %399 {offsets = [0, 64], sizes = [8, 32], strides = [1, 1]} : vector<8x96xf32> to vector<8x32xf32>
    %448 = vector.extract_strided_slice %403 {offsets = [0, 64], sizes = [8, 32], strides = [1, 1]} : vector<8x96xf32> to vector<8x32xf32>
    %449 = arith.addf %448, %17 : vector<8x32xf32>
    %450 = arith.mulf %438, %449 : vector<8x32xf32>
    %451 = arith.addf %447, %450 : vector<8x32xf32>
    %452 = math.tanh %451 : vector<8x32xf32>
    %cst_98 = arith.constant 1.000000e+00 : f32
    %453 = vector.broadcast %cst_98 : f32 to vector<8x32xf32>
    %454 = arith.subf %453, %446 : vector<8x32xf32>
    %455 = arith.mulf %454, %452 : vector<8x32xf32>
    %456 = arith.mulf %446, %390 : vector<8x32xf32>
    %457 = arith.addf %455, %456 : vector<8x32xf32>
    %458 = vector.broadcast %c4_i32 : i32 to vector<8x1xi32>
    %459 = arith.cmpi sgt, %0, %458 : vector<8x1xi32>
    %460 = vector.broadcast %391 : i32 to vector<8x1xi32>
    %461 = arith.cmpi sgt, %0, %460 : vector<8x1xi32>
    %cst_99 = arith.constant 0.000000e+00 : f32
    %462 = vector.shape_cast %459 : vector<8x1xi1> to vector<8x1xi1>
    %463 = vector.broadcast %462 : vector<8x1xi1> to vector<8x32xi1>
    %464 = vector.broadcast %cst_99 : f32 to vector<8x32xf32>
    %465 = arith.select %463, %430, %464 : vector<8x32xi1>, vector<8x32xf32>
    %466 = arith.index_cast %c4_i32 : i32 to index
    %c0_100 = arith.constant 0 : index
    %c0_101 = arith.constant 0 : index
    %467 = vector.load %arg8[%466, %c0_100, %c0_101] : memref<8x8x64xf32, #tpu.memory_space<vmem>>, vector<1x8x32xf32>
    %468 = vector.shape_cast %467 : vector<1x8x32xf32> to vector<8x32xf32>
    %469 = vector.shape_cast %465 : vector<8x32xf32> to vector<1x8x32xf32>
    tpu.vector_store %arg8[%466, %c0_100, %c0_101], %469 {strides = array<i32>} : memref<8x8x64xf32, #tpu.memory_space<vmem>>, vector<1x8x32xf32>,
    %cst_102 = arith.constant 0.000000e+00 : f32
    %470 = vector.shape_cast %461 : vector<8x1xi1> to vector<8x1xi1>
    %471 = vector.broadcast %470 : vector<8x1xi1> to vector<8x32xi1>
    %472 = vector.broadcast %cst_102 : f32 to vector<8x32xf32>
    %473 = arith.select %471, %457, %472 : vector<8x32xi1>, vector<8x32xf32>
    %474 = arith.index_cast %391 : i32 to index
    %c0_103 = arith.constant 0 : index
    %c32_104 = arith.constant 32 : index
    %475 = vector.load %arg8[%474, %c0_103, %c32_104] : memref<8x8x64xf32, #tpu.memory_space<vmem>>, vector<1x8x32xf32>
    %476 = vector.shape_cast %475 : vector<1x8x32xf32> to vector<8x32xf32>
    %477 = vector.shape_cast %473 : vector<8x32xf32> to vector<1x8x32xf32>
    tpu.vector_store %arg8[%474, %c0_103, %c32_104], %477 {strides = array<i32>} : memref<8x8x64xf32, #tpu.memory_space<vmem>>, vector<1x8x32xf32>,
    %478 = vector.shape_cast %459 : vector<8x1xi1> to vector<8x1xi1>
    %479 = vector.broadcast %478 : vector<8x1xi1> to vector<8x32xi1>
    %480 = arith.select %479, %430, %387 : vector<8x32xi1>, vector<8x32xf32>
    %481 = vector.shape_cast %461 : vector<8x1xi1> to vector<8x1xi1>
    %482 = vector.broadcast %481 : vector<8x1xi1> to vector<8x32xi1>
    %483 = arith.select %482, %457, %390 : vector<8x32xi1>, vector<8x32xf32>
    %c5_i32 = arith.constant 5 : i32
    %c7_i32_105 = arith.constant 7 : i32
    %484 = arith.subi %c7_i32_105, %c5_i32 : i32
    %c8_i32_106 = arith.constant 8 : i32
    %485 = arith.muli %c5_i32, %c8_i32_106 : i32
    %486 = tpu.assume_multiple %485, 8 : i32
    %c8_i32_107 = arith.constant 8 : i32
    %487 = arith.muli %484, %c8_i32_107 : i32
    %488 = tpu.assume_multiple %487, 8 : i32
    %489 = arith.index_cast %486 : i32 to index
    %c0_108 = arith.constant 0 : index
    %490 = vector.load %arg10[%489, %c0_108] : memref<64x96xf32, #tpu.memory_space<vmem>>, vector<8x96xf32>
    %491 = arith.index_cast %488 : i32 to index
    %c0_109 = arith.constant 0 : index
    %492 = vector.load %arg11[%491, %c0_109] : memref<64x96xf32, #tpu.memory_space<vmem>>, vector<8x96xf32>
    %493 = tpu.concatenate %480, %483 in 1 : vector<8x32xf32>, vector<8x32xf32> -> vector<8x64xf32>
    %cst_110 = arith.constant dense<0.000000e+00> : vector<8x192xf32>
    %494 = tpu.matmul %493, %11, %cst_110 {dimension_numbers = #tpu.dot_dimension_numbers<[1], [0], [0], [1], [0, 0, 1, 1], [], []>} : vector<8x64xf32>, vector<64x192xf32>, vector<8x192xf32> -> vector<8x192xf32>
    %495 = vector.extract_strided_slice %494 {offsets = [0, 0], sizes = [8, 96], strides = [1, 1]} : vector<8x192xf32> to vector<8x96xf32>
    %496 = vector.extract_strided_slice %494 {offsets = [0, 96], sizes = [8, 96], strides = [1, 1]} : vector<8x192xf32> to vector<8x96xf32>
    %497 = vector.extract_strided_slice %490 {offsets = [0, 0], sizes = [8, 32], strides = [1, 1]} : vector<8x96xf32> to vector<8x32xf32>
    %498 = vector.extract_strided_slice %495 {offsets = [0, 0], sizes = [8, 32], strides = [1, 1]} : vector<8x96xf32> to vector<8x32xf32>
    %499 = arith.addf %497, %498 : vector<8x32xf32>
    %500 = arith.negf %499 : vector<8x32xf32>
    %501 = math.exp %500 : vector<8x32xf32>
    %cst_111 = arith.constant 1.000000e+00 : f32
    %502 = vector.broadcast %cst_111 : f32 to vector<8x32xf32>
    %503 = arith.addf %502, %501 : vector<8x32xf32>
    %504 = arith.divf %502, %503 : vector<8x32xf32>
    %505 = vector.extract_strided_slice %490 {offsets = [0, 32], sizes = [8, 32], strides = [1, 1]} : vector<8x96xf32> to vector<8x32xf32>
    %506 = vector.extract_strided_slice %495 {offsets = [0, 32], sizes = [8, 32], strides = [1, 1]} : vector<8x96xf32> to vector<8x32xf32>
    %507 = arith.addf %505, %506 : vector<8x32xf32>
    %508 = arith.negf %507 : vector<8x32xf32>
    %509 = math.exp %508 : vector<8x32xf32>
    %cst_112 = arith.constant 1.000000e+00 : f32
    %510 = vector.broadcast %cst_112 : f32 to vector<8x32xf32>
    %511 = arith.addf %510, %509 : vector<8x32xf32>
    %512 = arith.divf %510, %511 : vector<8x32xf32>
    %513 = vector.extract_strided_slice %490 {offsets = [0, 64], sizes = [8, 32], strides = [1, 1]} : vector<8x96xf32> to vector<8x32xf32>
    %514 = vector.extract_strided_slice %495 {offsets = [0, 64], sizes = [8, 32], strides = [1, 1]} : vector<8x96xf32> to vector<8x32xf32>
    %515 = arith.addf %514, %14 : vector<8x32xf32>
    %516 = arith.mulf %504, %515 : vector<8x32xf32>
    %517 = arith.addf %513, %516 : vector<8x32xf32>
    %518 = math.tanh %517 : vector<8x32xf32>
    %cst_113 = arith.constant 1.000000e+00 : f32
    %519 = vector.broadcast %cst_113 : f32 to vector<8x32xf32>
    %520 = arith.subf %519, %512 : vector<8x32xf32>
    %521 = arith.mulf %520, %518 : vector<8x32xf32>
    %522 = arith.mulf %512, %480 : vector<8x32xf32>
    %523 = arith.addf %521, %522 : vector<8x32xf32>
    %524 = vector.extract_strided_slice %492 {offsets = [0, 0], sizes = [8, 32], strides = [1, 1]} : vector<8x96xf32> to vector<8x32xf32>
    %525 = vector.extract_strided_slice %496 {offsets = [0, 0], sizes = [8, 32], strides = [1, 1]} : vector<8x96xf32> to vector<8x32xf32>
    %526 = arith.addf %524, %525 : vector<8x32xf32>
    %527 = arith.negf %526 : vector<8x32xf32>
    %528 = math.exp %527 : vector<8x32xf32>
    %cst_114 = arith.constant 1.000000e+00 : f32
    %529 = vector.broadcast %cst_114 : f32 to vector<8x32xf32>
    %530 = arith.addf %529, %528 : vector<8x32xf32>
    %531 = arith.divf %529, %530 : vector<8x32xf32>
    %532 = vector.extract_strided_slice %492 {offsets = [0, 32], sizes = [8, 32], strides = [1, 1]} : vector<8x96xf32> to vector<8x32xf32>
    %533 = vector.extract_strided_slice %496 {offsets = [0, 32], sizes = [8, 32], strides = [1, 1]} : vector<8x96xf32> to vector<8x32xf32>
    %534 = arith.addf %532, %533 : vector<8x32xf32>
    %535 = arith.negf %534 : vector<8x32xf32>
    %536 = math.exp %535 : vector<8x32xf32>
    %cst_115 = arith.constant 1.000000e+00 : f32
    %537 = vector.broadcast %cst_115 : f32 to vector<8x32xf32>
    %538 = arith.addf %537, %536 : vector<8x32xf32>
    %539 = arith.divf %537, %538 : vector<8x32xf32>
    %540 = vector.extract_strided_slice %492 {offsets = [0, 64], sizes = [8, 32], strides = [1, 1]} : vector<8x96xf32> to vector<8x32xf32>
    %541 = vector.extract_strided_slice %496 {offsets = [0, 64], sizes = [8, 32], strides = [1, 1]} : vector<8x96xf32> to vector<8x32xf32>
    %542 = arith.addf %541, %17 : vector<8x32xf32>
    %543 = arith.mulf %531, %542 : vector<8x32xf32>
    %544 = arith.addf %540, %543 : vector<8x32xf32>
    %545 = math.tanh %544 : vector<8x32xf32>
    %cst_116 = arith.constant 1.000000e+00 : f32
    %546 = vector.broadcast %cst_116 : f32 to vector<8x32xf32>
    %547 = arith.subf %546, %539 : vector<8x32xf32>
    %548 = arith.mulf %547, %545 : vector<8x32xf32>
    %549 = arith.mulf %539, %483 : vector<8x32xf32>
    %550 = arith.addf %548, %549 : vector<8x32xf32>
    %551 = vector.broadcast %c5_i32 : i32 to vector<8x1xi32>
    %552 = arith.cmpi sgt, %0, %551 : vector<8x1xi32>
    %553 = vector.broadcast %484 : i32 to vector<8x1xi32>
    %554 = arith.cmpi sgt, %0, %553 : vector<8x1xi32>
    %cst_117 = arith.constant 0.000000e+00 : f32
    %555 = vector.shape_cast %552 : vector<8x1xi1> to vector<8x1xi1>
    %556 = vector.broadcast %555 : vector<8x1xi1> to vector<8x32xi1>
    %557 = vector.broadcast %cst_117 : f32 to vector<8x32xf32>
    %558 = arith.select %556, %523, %557 : vector<8x32xi1>, vector<8x32xf32>
    %559 = arith.index_cast %c5_i32 : i32 to index
    %c0_118 = arith.constant 0 : index
    %c0_119 = arith.constant 0 : index
    %560 = vector.load %arg8[%559, %c0_118, %c0_119] : memref<8x8x64xf32, #tpu.memory_space<vmem>>, vector<1x8x32xf32>
    %561 = vector.shape_cast %560 : vector<1x8x32xf32> to vector<8x32xf32>
    %562 = vector.shape_cast %558 : vector<8x32xf32> to vector<1x8x32xf32>
    tpu.vector_store %arg8[%559, %c0_118, %c0_119], %562 {strides = array<i32>} : memref<8x8x64xf32, #tpu.memory_space<vmem>>, vector<1x8x32xf32>,
    %cst_120 = arith.constant 0.000000e+00 : f32
    %563 = vector.shape_cast %554 : vector<8x1xi1> to vector<8x1xi1>
    %564 = vector.broadcast %563 : vector<8x1xi1> to vector<8x32xi1>
    %565 = vector.broadcast %cst_120 : f32 to vector<8x32xf32>
    %566 = arith.select %564, %550, %565 : vector<8x32xi1>, vector<8x32xf32>
    %567 = arith.index_cast %484 : i32 to index
    %c0_121 = arith.constant 0 : index
    %c32_122 = arith.constant 32 : index
    %568 = vector.load %arg8[%567, %c0_121, %c32_122] : memref<8x8x64xf32, #tpu.memory_space<vmem>>, vector<1x8x32xf32>
    %569 = vector.shape_cast %568 : vector<1x8x32xf32> to vector<8x32xf32>
    %570 = vector.shape_cast %566 : vector<8x32xf32> to vector<1x8x32xf32>
    tpu.vector_store %arg8[%567, %c0_121, %c32_122], %570 {strides = array<i32>} : memref<8x8x64xf32, #tpu.memory_space<vmem>>, vector<1x8x32xf32>,
    %571 = vector.shape_cast %552 : vector<8x1xi1> to vector<8x1xi1>
    %572 = vector.broadcast %571 : vector<8x1xi1> to vector<8x32xi1>
    %573 = arith.select %572, %523, %480 : vector<8x32xi1>, vector<8x32xf32>
    %574 = vector.shape_cast %554 : vector<8x1xi1> to vector<8x1xi1>
    %575 = vector.broadcast %574 : vector<8x1xi1> to vector<8x32xi1>
    %576 = arith.select %575, %550, %483 : vector<8x32xi1>, vector<8x32xf32>
    %c6_i32 = arith.constant 6 : i32
    %c7_i32_123 = arith.constant 7 : i32
    %577 = arith.subi %c7_i32_123, %c6_i32 : i32
    %c8_i32_124 = arith.constant 8 : i32
    %578 = arith.muli %c6_i32, %c8_i32_124 : i32
    %579 = tpu.assume_multiple %578, 8 : i32
    %c8_i32_125 = arith.constant 8 : i32
    %580 = arith.muli %577, %c8_i32_125 : i32
    %581 = tpu.assume_multiple %580, 8 : i32
    %582 = arith.index_cast %579 : i32 to index
    %c0_126 = arith.constant 0 : index
    %583 = vector.load %arg10[%582, %c0_126] : memref<64x96xf32, #tpu.memory_space<vmem>>, vector<8x96xf32>
    %584 = arith.index_cast %581 : i32 to index
    %c0_127 = arith.constant 0 : index
    %585 = vector.load %arg11[%584, %c0_127] : memref<64x96xf32, #tpu.memory_space<vmem>>, vector<8x96xf32>
    %586 = tpu.concatenate %573, %576 in 1 : vector<8x32xf32>, vector<8x32xf32> -> vector<8x64xf32>
    %cst_128 = arith.constant dense<0.000000e+00> : vector<8x192xf32>
    %587 = tpu.matmul %586, %11, %cst_128 {dimension_numbers = #tpu.dot_dimension_numbers<[1], [0], [0], [1], [0, 0, 1, 1], [], []>} : vector<8x64xf32>, vector<64x192xf32>, vector<8x192xf32> -> vector<8x192xf32>
    %588 = vector.extract_strided_slice %587 {offsets = [0, 0], sizes = [8, 96], strides = [1, 1]} : vector<8x192xf32> to vector<8x96xf32>
    %589 = vector.extract_strided_slice %587 {offsets = [0, 96], sizes = [8, 96], strides = [1, 1]} : vector<8x192xf32> to vector<8x96xf32>
    %590 = vector.extract_strided_slice %583 {offsets = [0, 0], sizes = [8, 32], strides = [1, 1]} : vector<8x96xf32> to vector<8x32xf32>
    %591 = vector.extract_strided_slice %588 {offsets = [0, 0], sizes = [8, 32], strides = [1, 1]} : vector<8x96xf32> to vector<8x32xf32>
    %592 = arith.addf %590, %591 : vector<8x32xf32>
    %593 = arith.negf %592 : vector<8x32xf32>
    %594 = math.exp %593 : vector<8x32xf32>
    %cst_129 = arith.constant 1.000000e+00 : f32
    %595 = vector.broadcast %cst_129 : f32 to vector<8x32xf32>
    %596 = arith.addf %595, %594 : vector<8x32xf32>
    %597 = arith.divf %595, %596 : vector<8x32xf32>
    %598 = vector.extract_strided_slice %583 {offsets = [0, 32], sizes = [8, 32], strides = [1, 1]} : vector<8x96xf32> to vector<8x32xf32>
    %599 = vector.extract_strided_slice %588 {offsets = [0, 32], sizes = [8, 32], strides = [1, 1]} : vector<8x96xf32> to vector<8x32xf32>
    %600 = arith.addf %598, %599 : vector<8x32xf32>
    %601 = arith.negf %600 : vector<8x32xf32>
    %602 = math.exp %601 : vector<8x32xf32>
    %cst_130 = arith.constant 1.000000e+00 : f32
    %603 = vector.broadcast %cst_130 : f32 to vector<8x32xf32>
    %604 = arith.addf %603, %602 : vector<8x32xf32>
    %605 = arith.divf %603, %604 : vector<8x32xf32>
    %606 = vector.extract_strided_slice %583 {offsets = [0, 64], sizes = [8, 32], strides = [1, 1]} : vector<8x96xf32> to vector<8x32xf32>
    %607 = vector.extract_strided_slice %588 {offsets = [0, 64], sizes = [8, 32], strides = [1, 1]} : vector<8x96xf32> to vector<8x32xf32>
    %608 = arith.addf %607, %14 : vector<8x32xf32>
    %609 = arith.mulf %597, %608 : vector<8x32xf32>
    %610 = arith.addf %606, %609 : vector<8x32xf32>
    %611 = math.tanh %610 : vector<8x32xf32>
    %cst_131 = arith.constant 1.000000e+00 : f32
    %612 = vector.broadcast %cst_131 : f32 to vector<8x32xf32>
    %613 = arith.subf %612, %605 : vector<8x32xf32>
    %614 = arith.mulf %613, %611 : vector<8x32xf32>
    %615 = arith.mulf %605, %573 : vector<8x32xf32>
    %616 = arith.addf %614, %615 : vector<8x32xf32>
    %617 = vector.extract_strided_slice %585 {offsets = [0, 0], sizes = [8, 32], strides = [1, 1]} : vector<8x96xf32> to vector<8x32xf32>
    %618 = vector.extract_strided_slice %589 {offsets = [0, 0], sizes = [8, 32], strides = [1, 1]} : vector<8x96xf32> to vector<8x32xf32>
    %619 = arith.addf %617, %618 : vector<8x32xf32>
    %620 = arith.negf %619 : vector<8x32xf32>
    %621 = math.exp %620 : vector<8x32xf32>
    %cst_132 = arith.constant 1.000000e+00 : f32
    %622 = vector.broadcast %cst_132 : f32 to vector<8x32xf32>
    %623 = arith.addf %622, %621 : vector<8x32xf32>
    %624 = arith.divf %622, %623 : vector<8x32xf32>
    %625 = vector.extract_strided_slice %585 {offsets = [0, 32], sizes = [8, 32], strides = [1, 1]} : vector<8x96xf32> to vector<8x32xf32>
    %626 = vector.extract_strided_slice %589 {offsets = [0, 32], sizes = [8, 32], strides = [1, 1]} : vector<8x96xf32> to vector<8x32xf32>
    %627 = arith.addf %625, %626 : vector<8x32xf32>
    %628 = arith.negf %627 : vector<8x32xf32>
    %629 = math.exp %628 : vector<8x32xf32>
    %cst_133 = arith.constant 1.000000e+00 : f32
    %630 = vector.broadcast %cst_133 : f32 to vector<8x32xf32>
    %631 = arith.addf %630, %629 : vector<8x32xf32>
    %632 = arith.divf %630, %631 : vector<8x32xf32>
    %633 = vector.extract_strided_slice %585 {offsets = [0, 64], sizes = [8, 32], strides = [1, 1]} : vector<8x96xf32> to vector<8x32xf32>
    %634 = vector.extract_strided_slice %589 {offsets = [0, 64], sizes = [8, 32], strides = [1, 1]} : vector<8x96xf32> to vector<8x32xf32>
    %635 = arith.addf %634, %17 : vector<8x32xf32>
    %636 = arith.mulf %624, %635 : vector<8x32xf32>
    %637 = arith.addf %633, %636 : vector<8x32xf32>
    %638 = math.tanh %637 : vector<8x32xf32>
    %cst_134 = arith.constant 1.000000e+00 : f32
    %639 = vector.broadcast %cst_134 : f32 to vector<8x32xf32>
    %640 = arith.subf %639, %632 : vector<8x32xf32>
    %641 = arith.mulf %640, %638 : vector<8x32xf32>
    %642 = arith.mulf %632, %576 : vector<8x32xf32>
    %643 = arith.addf %641, %642 : vector<8x32xf32>
    %644 = vector.broadcast %c6_i32 : i32 to vector<8x1xi32>
    %645 = arith.cmpi sgt, %0, %644 : vector<8x1xi32>
    %646 = vector.broadcast %577 : i32 to vector<8x1xi32>
    %647 = arith.cmpi sgt, %0, %646 : vector<8x1xi32>
    %cst_135 = arith.constant 0.000000e+00 : f32
    %648 = vector.shape_cast %645 : vector<8x1xi1> to vector<8x1xi1>
    %649 = vector.broadcast %648 : vector<8x1xi1> to vector<8x32xi1>
    %650 = vector.broadcast %cst_135 : f32 to vector<8x32xf32>
    %651 = arith.select %649, %616, %650 : vector<8x32xi1>, vector<8x32xf32>
    %652 = arith.index_cast %c6_i32 : i32 to index
    %c0_136 = arith.constant 0 : index
    %c0_137 = arith.constant 0 : index
    %653 = vector.load %arg8[%652, %c0_136, %c0_137] : memref<8x8x64xf32, #tpu.memory_space<vmem>>, vector<1x8x32xf32>
    %654 = vector.shape_cast %653 : vector<1x8x32xf32> to vector<8x32xf32>
    %655 = vector.shape_cast %651 : vector<8x32xf32> to vector<1x8x32xf32>
    tpu.vector_store %arg8[%652, %c0_136, %c0_137], %655 {strides = array<i32>} : memref<8x8x64xf32, #tpu.memory_space<vmem>>, vector<1x8x32xf32>,
    %cst_138 = arith.constant 0.000000e+00 : f32
    %656 = vector.shape_cast %647 : vector<8x1xi1> to vector<8x1xi1>
    %657 = vector.broadcast %656 : vector<8x1xi1> to vector<8x32xi1>
    %658 = vector.broadcast %cst_138 : f32 to vector<8x32xf32>
    %659 = arith.select %657, %643, %658 : vector<8x32xi1>, vector<8x32xf32>
    %660 = arith.index_cast %577 : i32 to index
    %c0_139 = arith.constant 0 : index
    %c32_140 = arith.constant 32 : index
    %661 = vector.load %arg8[%660, %c0_139, %c32_140] : memref<8x8x64xf32, #tpu.memory_space<vmem>>, vector<1x8x32xf32>
    %662 = vector.shape_cast %661 : vector<1x8x32xf32> to vector<8x32xf32>
    %663 = vector.shape_cast %659 : vector<8x32xf32> to vector<1x8x32xf32>
    tpu.vector_store %arg8[%660, %c0_139, %c32_140], %663 {strides = array<i32>} : memref<8x8x64xf32, #tpu.memory_space<vmem>>, vector<1x8x32xf32>,
    %664 = vector.shape_cast %645 : vector<8x1xi1> to vector<8x1xi1>
    %665 = vector.broadcast %664 : vector<8x1xi1> to vector<8x32xi1>
    %666 = arith.select %665, %616, %573 : vector<8x32xi1>, vector<8x32xf32>
    %667 = vector.shape_cast %647 : vector<8x1xi1> to vector<8x1xi1>
    %668 = vector.broadcast %667 : vector<8x1xi1> to vector<8x32xi1>
    %669 = arith.select %668, %643, %576 : vector<8x32xi1>, vector<8x32xf32>
    %c7_i32_141 = arith.constant 7 : i32
    %c7_i32_142 = arith.constant 7 : i32
    %670 = arith.subi %c7_i32_142, %c7_i32_141 : i32
    %c8_i32_143 = arith.constant 8 : i32
    %671 = arith.muli %c7_i32_141, %c8_i32_143 : i32
    %672 = tpu.assume_multiple %671, 8 : i32
    %c8_i32_144 = arith.constant 8 : i32
    %673 = arith.muli %670, %c8_i32_144 : i32
    %674 = tpu.assume_multiple %673, 8 : i32
    %675 = arith.index_cast %672 : i32 to index
    %c0_145 = arith.constant 0 : index
    %676 = vector.load %arg10[%675, %c0_145] : memref<64x96xf32, #tpu.memory_space<vmem>>, vector<8x96xf32>
    %677 = arith.index_cast %674 : i32 to index
    %c0_146 = arith.constant 0 : index
    %678 = vector.load %arg11[%677, %c0_146] : memref<64x96xf32, #tpu.memory_space<vmem>>, vector<8x96xf32>
    %679 = tpu.concatenate %666, %669 in 1 : vector<8x32xf32>, vector<8x32xf32> -> vector<8x64xf32>
    %cst_147 = arith.constant dense<0.000000e+00> : vector<8x192xf32>
    %680 = tpu.matmul %679, %11, %cst_147 {dimension_numbers = #tpu.dot_dimension_numbers<[1], [0], [0], [1], [0, 0, 1, 1], [], []>} : vector<8x64xf32>, vector<64x192xf32>, vector<8x192xf32> -> vector<8x192xf32>
    %681 = vector.extract_strided_slice %680 {offsets = [0, 0], sizes = [8, 96], strides = [1, 1]} : vector<8x192xf32> to vector<8x96xf32>
    %682 = vector.extract_strided_slice %680 {offsets = [0, 96], sizes = [8, 96], strides = [1, 1]} : vector<8x192xf32> to vector<8x96xf32>
    %683 = vector.extract_strided_slice %676 {offsets = [0, 0], sizes = [8, 32], strides = [1, 1]} : vector<8x96xf32> to vector<8x32xf32>
    %684 = vector.extract_strided_slice %681 {offsets = [0, 0], sizes = [8, 32], strides = [1, 1]} : vector<8x96xf32> to vector<8x32xf32>
    %685 = arith.addf %683, %684 : vector<8x32xf32>
    %686 = arith.negf %685 : vector<8x32xf32>
    %687 = math.exp %686 : vector<8x32xf32>
    %cst_148 = arith.constant 1.000000e+00 : f32
    %688 = vector.broadcast %cst_148 : f32 to vector<8x32xf32>
    %689 = arith.addf %688, %687 : vector<8x32xf32>
    %690 = arith.divf %688, %689 : vector<8x32xf32>
    %691 = vector.extract_strided_slice %676 {offsets = [0, 32], sizes = [8, 32], strides = [1, 1]} : vector<8x96xf32> to vector<8x32xf32>
    %692 = vector.extract_strided_slice %681 {offsets = [0, 32], sizes = [8, 32], strides = [1, 1]} : vector<8x96xf32> to vector<8x32xf32>
    %693 = arith.addf %691, %692 : vector<8x32xf32>
    %694 = arith.negf %693 : vector<8x32xf32>
    %695 = math.exp %694 : vector<8x32xf32>
    %cst_149 = arith.constant 1.000000e+00 : f32
    %696 = vector.broadcast %cst_149 : f32 to vector<8x32xf32>
    %697 = arith.addf %696, %695 : vector<8x32xf32>
    %698 = arith.divf %696, %697 : vector<8x32xf32>
    %699 = vector.extract_strided_slice %676 {offsets = [0, 64], sizes = [8, 32], strides = [1, 1]} : vector<8x96xf32> to vector<8x32xf32>
    %700 = vector.extract_strided_slice %681 {offsets = [0, 64], sizes = [8, 32], strides = [1, 1]} : vector<8x96xf32> to vector<8x32xf32>
    %701 = arith.addf %700, %14 : vector<8x32xf32>
    %702 = arith.mulf %690, %701 : vector<8x32xf32>
    %703 = arith.addf %699, %702 : vector<8x32xf32>
    %704 = math.tanh %703 : vector<8x32xf32>
    %cst_150 = arith.constant 1.000000e+00 : f32
    %705 = vector.broadcast %cst_150 : f32 to vector<8x32xf32>
    %706 = arith.subf %705, %698 : vector<8x32xf32>
    %707 = arith.mulf %706, %704 : vector<8x32xf32>
    %708 = arith.mulf %698, %666 : vector<8x32xf32>
    %709 = arith.addf %707, %708 : vector<8x32xf32>
    %710 = vector.extract_strided_slice %678 {offsets = [0, 0], sizes = [8, 32], strides = [1, 1]} : vector<8x96xf32> to vector<8x32xf32>
    %711 = vector.extract_strided_slice %682 {offsets = [0, 0], sizes = [8, 32], strides = [1, 1]} : vector<8x96xf32> to vector<8x32xf32>
    %712 = arith.addf %710, %711 : vector<8x32xf32>
    %713 = arith.negf %712 : vector<8x32xf32>
    %714 = math.exp %713 : vector<8x32xf32>
    %cst_151 = arith.constant 1.000000e+00 : f32
    %715 = vector.broadcast %cst_151 : f32 to vector<8x32xf32>
    %716 = arith.addf %715, %714 : vector<8x32xf32>
    %717 = arith.divf %715, %716 : vector<8x32xf32>
    %718 = vector.extract_strided_slice %678 {offsets = [0, 32], sizes = [8, 32], strides = [1, 1]} : vector<8x96xf32> to vector<8x32xf32>
    %719 = vector.extract_strided_slice %682 {offsets = [0, 32], sizes = [8, 32], strides = [1, 1]} : vector<8x96xf32> to vector<8x32xf32>
    %720 = arith.addf %718, %719 : vector<8x32xf32>
    %721 = arith.negf %720 : vector<8x32xf32>
    %722 = math.exp %721 : vector<8x32xf32>
    %cst_152 = arith.constant 1.000000e+00 : f32
    %723 = vector.broadcast %cst_152 : f32 to vector<8x32xf32>
    %724 = arith.addf %723, %722 : vector<8x32xf32>
    %725 = arith.divf %723, %724 : vector<8x32xf32>
    %726 = vector.extract_strided_slice %678 {offsets = [0, 64], sizes = [8, 32], strides = [1, 1]} : vector<8x96xf32> to vector<8x32xf32>
    %727 = vector.extract_strided_slice %682 {offsets = [0, 64], sizes = [8, 32], strides = [1, 1]} : vector<8x96xf32> to vector<8x32xf32>
    %728 = arith.addf %727, %17 : vector<8x32xf32>
    %729 = arith.mulf %717, %728 : vector<8x32xf32>
    %730 = arith.addf %726, %729 : vector<8x32xf32>
    %731 = math.tanh %730 : vector<8x32xf32>
    %cst_153 = arith.constant 1.000000e+00 : f32
    %732 = vector.broadcast %cst_153 : f32 to vector<8x32xf32>
    %733 = arith.subf %732, %725 : vector<8x32xf32>
    %734 = arith.mulf %733, %731 : vector<8x32xf32>
    %735 = arith.mulf %725, %669 : vector<8x32xf32>
    %736 = arith.addf %734, %735 : vector<8x32xf32>
    %737 = vector.broadcast %c7_i32_141 : i32 to vector<8x1xi32>
    %738 = arith.cmpi sgt, %0, %737 : vector<8x1xi32>
    %739 = vector.broadcast %670 : i32 to vector<8x1xi32>
    %740 = arith.cmpi sgt, %0, %739 : vector<8x1xi32>
    %cst_154 = arith.constant 0.000000e+00 : f32
    %741 = vector.shape_cast %738 : vector<8x1xi1> to vector<8x1xi1>
    %742 = vector.broadcast %741 : vector<8x1xi1> to vector<8x32xi1>
    %743 = vector.broadcast %cst_154 : f32 to vector<8x32xf32>
    %744 = arith.select %742, %709, %743 : vector<8x32xi1>, vector<8x32xf32>
    %745 = arith.index_cast %c7_i32_141 : i32 to index
    %c0_155 = arith.constant 0 : index
    %c0_156 = arith.constant 0 : index
    %746 = vector.load %arg8[%745, %c0_155, %c0_156] : memref<8x8x64xf32, #tpu.memory_space<vmem>>, vector<1x8x32xf32>
    %747 = vector.shape_cast %746 : vector<1x8x32xf32> to vector<8x32xf32>
    %748 = vector.shape_cast %744 : vector<8x32xf32> to vector<1x8x32xf32>
    tpu.vector_store %arg8[%745, %c0_155, %c0_156], %748 {strides = array<i32>} : memref<8x8x64xf32, #tpu.memory_space<vmem>>, vector<1x8x32xf32>,
    %cst_157 = arith.constant 0.000000e+00 : f32
    %749 = vector.shape_cast %740 : vector<8x1xi1> to vector<8x1xi1>
    %750 = vector.broadcast %749 : vector<8x1xi1> to vector<8x32xi1>
    %751 = vector.broadcast %cst_157 : f32 to vector<8x32xf32>
    %752 = arith.select %750, %736, %751 : vector<8x32xi1>, vector<8x32xf32>
    %753 = arith.index_cast %670 : i32 to index
    %c0_158 = arith.constant 0 : index
    %c32_159 = arith.constant 32 : index
    %754 = vector.load %arg8[%753, %c0_158, %c32_159] : memref<8x8x64xf32, #tpu.memory_space<vmem>>, vector<1x8x32xf32>
    %755 = vector.shape_cast %754 : vector<1x8x32xf32> to vector<8x32xf32>
    %756 = vector.shape_cast %752 : vector<8x32xf32> to vector<1x8x32xf32>
    tpu.vector_store %arg8[%753, %c0_158, %c32_159], %756 {strides = array<i32>} : memref<8x8x64xf32, #tpu.memory_space<vmem>>, vector<1x8x32xf32>,
    %757 = vector.shape_cast %738 : vector<8x1xi1> to vector<8x1xi1>
    %758 = vector.broadcast %757 : vector<8x1xi1> to vector<8x32xi1>
    %759 = arith.select %758, %709, %666 : vector<8x32xi1>, vector<8x32xf32>
    %760 = vector.shape_cast %740 : vector<8x1xi1> to vector<8x1xi1>
    %761 = vector.broadcast %760 : vector<8x1xi1> to vector<8x32xi1>
    %762 = arith.select %761, %736, %669 : vector<8x32xi1>, vector<8x32xf32>
    %c8_i32_160 = arith.constant 8 : i32
    %763 = tpu.concatenate %759, %762 in 1 : vector<8x32xf32>, vector<8x32xf32> -> vector<8x64xf32>
    %c0_161 = arith.constant 0 : index
    %c0_162 = arith.constant 0 : index
    %764 = vector.load %arg6[%c0_161, %c0_162] : memref<64x32xf32, #tpu.memory_space<vmem>>, vector<64x32xf32>
    %cst_163 = arith.constant dense<0.000000e+00> : vector<8x32xf32>
    %765 = tpu.matmul %763, %764, %cst_163 {dimension_numbers = #tpu.dot_dimension_numbers<[1], [0], [0], [1], [0, 0, 1, 1], [], []>} : vector<8x64xf32>, vector<64x32xf32>, vector<8x32xf32> -> vector<8x32xf32>
    %c0_164 = arith.constant 0 : index
    %c0_165 = arith.constant 0 : index
    %766 = vector.load %arg7[%c0_164, %c0_165] : memref<1x32xf32, #tpu.memory_space<vmem>>, vector<1x32xf32>
    %767 = vector.broadcast %766 : vector<1x32xf32> to vector<8x32xf32>
    %768 = arith.addf %765, %767 : vector<8x32xf32>
    %769 = math.tanh %768 : vector<8x32xf32>
    %c0_166 = arith.constant 0 : index
    %c0_167 = arith.constant 0 : index
    %770 = vector.load %arg9[%c0_166, %c0_167] : memref<8x32xf32, #tpu.memory_space<vmem>>, vector<8x32xf32>
    tpu.vector_store %arg9[%c0_166, %c0_167], %769 {strides = array<i32>} : memref<8x32xf32, #tpu.memory_space<vmem>>, vector<8x32xf32>,
    return
  }
}

</mosaic_0001>

<bundles_post_ra>
// kernel: encoder_forward.1
= control target key start
LH: loop header
LB: loop body
LE: loop exit
PB: predicated region body
PF: predicated region fallthrough
CT: control target
= control target key end

     0   :  { %v1986_v3 = vmov 0.0   ;;  %vm60_vm0 = vcmask 261120   ;;  %s1987_s16 = smov 64   ;;  %v50_v34 = vlaneseq  ;;  %vm198_vm1 = vcmask 785408   ;;  %s1989_s12 = smov 96   ;;  %s2938_s2 = inlined_call_operand.vmem [shape: f32[32,192], index: 2, kind: input, shape index: {}]   ;;  %s2939_s4 = inlined_call_operand.vmem [shape: f32[64,192], index: 4, kind: input, shape index: {}]   ;;  %s2940_s0 = inlined_call_operand.vmem [shape: f32[64,32], index: 0, kind: input, shape index: {}]   ;;  %s2941_s5 = inlined_call_operand.vmem [shape: f32[1,64], index: 5, kind: input, shape index: {}]   ;;  %s2942_s3 = inlined_call_operand.vmem [shape: f32[1,192], index: 3, kind: input, shape index: {}]   ;;  %s2943_s1 = inlined_call_operand.vmem [shape: s32[8,1], index: 1, kind: input, shape index: {}]   ;;  %s2944_s8 = inlined_call_operand.vmem [shape: f32[8,8,64], index: 8, kind: output, shape index: {0}]   ;;  %s2945_s6 = inlined_call_operand.vmem [shape: f32[64,32], index: 6, kind: input, shape index: {}]   ;;  %s2946_s7 = inlined_call_operand.vmem [shape: f32[1,32], index: 7, kind: input, shape index: {}]   ;;  %s2947_s9 = inlined_call_operand.vmem [shape: f32[8,32], index: 9, kind: output, shape index: {1}]  }
   0x1   :  { %v47_v0 = vld [vmem:[%s2938_s2 + $0x38] sm:$0xff]  ;;  %v46_v2 = vld [vmem:[%s2938_s2 + $0x30] sm:$0xff]  ;;  %149 = vmatprep.mubr.f32.mxu0 %v1986_v3  ;;  %373 = vmatprep.mubr.f32.mxu1 %v1986_v3  ;;  %v45_v5 = vld [vmem:[%s2938_s2 + $0x28] sm:$0xff]  ;;  %vm472_vm5 = vcmask 523520   ;;  %vm305_vm7 = vcmask 523264  }
   0x2   :  { %v2048_v1 = vld [vmem:[%s2939_s4 + $0x78] sm:$0xff]  ;;  %109 = vmatprep.subr.mxu0 %v47_v0  ;;  %v2059_v4 = vld [vmem:[%s2939_s4 + $0x70] sm:$0xff]  ;;  %v2067_v6 = vld [vmem:[%s2939_s4 + $0x68] sm:$0xff]  ;;  %v51_v35 = vshrl.u32 %v50_v34, 7 }
   0x3   :  { %325 = vmatprep.subr.mxu1 %v2048_v1  ;;  %110 = vmatpush1.msra.mxu0 %v46_v2  ;;  %v44_v7 = vld [vmem:[%s2938_s2 + $0x20] sm:$0xff]  ;;  %v43_v9 = vld [vmem:[%s2938_s2 + $0x18] sm:$0xff]  ;;  %v42_v11 = vld [vmem:[%s2938_s2 + $0x10] sm:$0xff] }
   0x4   :  { %326 = vmatpush1.msra.mxu1 %v2059_v4  ;;  %v2076_v8 = vld [vmem:[%s2939_s4 + $0x60] sm:$0xff]  ;;  %111 = vmatprep.subr.mxu0 %v45_v5  ;;  %v2085_v10 = vld [vmem:[%s2939_s4 + $0x58] sm:$0xff]  ;;  %v2093_v12 = vld [vmem:[%s2939_s4 + $0x50] sm:$0xff]  ;;  %v52_v36 = vsub.s32 0, %v51_v35  ;;  %v56_v39 = vsub.s32 1, %v51_v35 }
   0x5   :  { %327 = vmatprep.subr.mxu1 %v2067_v6  ;;  %112 = vmatpush1.msra.mxu0 %v44_v7  ;;  %v41_v13 = vld [vmem:[%s2938_s2 + $0x8] sm:$0xff]  ;;  %v40_v15 = vld [vmem:[%s2938_s2] sm:$0xff]  ;;  %v2120_v18 = vld [vmem:[%s2939_s4 + $0x38] sm:$0xff] }
   0x6   :  { %328 = vmatpush1.msra.mxu1 %v2076_v8  ;;  %v2102_v14 = vld [vmem:[%s2939_s4 + $0x48] sm:$0xff]  ;;  %113 = vmatprep.subr.mxu0 %v43_v9  ;;  %v2111_v16 = vld [vmem:[%s2939_s4 + $0x40] sm:$0xff]  ;;  %v2126_v19 = vld [vmem:[%s2939_s4 + $0x30] sm:$0xff] }
   0x7   :  { %329 = vmatprep.subr.mxu1 %v2085_v10  ;;  %114 = vmatpush1.msra.mxu0 %v42_v11  ;;  %v32_v17 = vld [vmem:[%s2940_s0] sm:$0xff]  ;;  %v2132_v20 = vld [vmem:[%s2939_s4 + $0x28] sm:$0xff]  ;;  %v2149_v23 = vld [vmem:[%s2939_s4 + $0x18] sm:$0xff] }
   0x8   :  { %330 = vmatpush1.msra.mxu1 %v2093_v12  ;;  %115 = vmatprep.subr.mxu0 %v41_v13  ;;  %v2139_v21 = vld [vmem:[%s2939_s4 + $0x20] sm:$0xff]  ;;  %v33_v22 = vld [vmem:[%s2940_s0 + $0x8] sm:$0xff]  ;;  %v2160_v25 = vld [vmem:[%s2939_s4 + $0x10] sm:$0xff] }
   0x9   :  { %331 = vmatprep.subr.mxu1 %v2102_v14  ;;  %116 = vmatpush1.msra.mxu0 %v40_v15  ;;  %v2154_v24 = vld [vmem:[%s2941_s5] ss:$0 sm:$0xff]  ;;  %v2168_v26 = vld [vmem:[%s2939_s4 + $0x8] sm:$0xff]  ;;  %v34_v28 = vld [vmem:[%s2940_s0 + $0x10] sm:$0xff] }
   0xa   :  { %332 = vmatpush1.msra.mxu1 %v2111_v16  ;;  %1748 = vmatmul.mubr.msk.f32.vlgmr.msra.gmra.mxu0 %vm60_vm0, %v32_v17  ;;  %v2176_v27 = vld [vmem:[%s2939_s4] sm:$0xff]  ;;  %v35_v29 = vld [vmem:[%s2940_s0 + $0x18] sm:$0xff]  ;;  %v37_v31 = vld [vmem:[%s2940_s0 + $0x28] sm:$0xff] }
   0xb   :  { %333 = vmatprep.subr.mxu1 %v2120_v18  ;;  %155 = vmatprep.mubr.f32.mxu0 %v1986_v3  ;;  %v36_v30 = vld [vmem:[%s2940_s0 + $0x20] sm:$0xff]  ;;  %v38_v32 = vld [vmem:[%s2940_s0 + $0x30] sm:$0xff]  ;;  %v39_v33 = vld [vmem:[%s2940_s0 + $0x38] sm:$0xff] }
   0xc   :  { %334 = vmatpush1.msra.mxu1 %v2126_v19  ;;  %387 = vrot.lane.b32.xlu0 %v2154_v24, %s1987_s16  ;;  %v48_v37 = vld [vmem:[%s2942_s3] sm:$0x3]  ;;  %s1988_s3 = smov 32  }
   0xd   :  { %335 = vmatprep.subr.mxu1 %v2132_v20  ;;  %674 = vmatprep.subr.mxu0 %v2048_v1  ;;  %v53_v38 = vrot.slane %v48_v37, %v52_v36  ;;  %v57_v42 = vrot.slane %v48_v37, %v56_v39  ;;  %v1990_v37 = vmov 0  }
   0xe   :  { %336 = vmatpush1.msra.mxu1 %v2139_v21  ;;  %1749 = vmatmul.mubr.msk.f32.gmra.mxu0 %vm60_vm0, %v33_v22 }
   0xf   :  { %337 = vmatprep.subr.mxu1 %v2149_v23  ;;  %161 = vmatprep.mubr.f32.mxu0 %v1986_v3 }
  0x10   :  { %338 = vmatpush1.msra.mxu1 %v2160_v25  ;;  %675 = vmatpush1.msra.mxu0 %v2059_v4 }
  0x11   :  { %339 = vmatprep.subr.mxu1 %v2168_v26  ;;  %676 = vmatprep.subr.mxu0 %v2067_v6 }
  0x12   :  { %340 = vmatpush1.msra.mxu1 %v2176_v27  ;;  %1750 = vmatmul.mubr.msk.f32.gmra.mxu0 %vm60_vm0, %v34_v28 }
  0x13   :  { %374 = vmatmul.mubr.f32.vlgmr.msra.gmra.mxu1 %v1986_v3  ;;  %167 = vmatprep.mubr.f32.mxu0 %v1986_v3 }
  0x14   :  { %498 = vmatprep.subr.mxu1 %v2048_v1  ;;  %546 = vmatprep.mubr.f32.mxu1 %v1986_v3 }
  0x15   :  { %499 = vmatpush1.msra.mxu1 %v2059_v4  ;;  %677 = vmatpush1.msra.mxu0 %v2076_v8 }
  0x16   :  { %500 = vmatprep.subr.mxu1 %v2067_v6  ;;  %1751 = vmatmul.mubr.msk.f32.gmra.mxu0 %vm60_vm0, %v35_v29 }
  0x17   :  { %501 = vmatpush1.msra.mxu1 %v2076_v8  ;;  %173 = vmatprep.mubr.f32.mxu0 %v1986_v3 }
  0x18   :  { %502 = vmatprep.subr.mxu1 %v2085_v10  ;;  %678 = vmatprep.subr.mxu0 %v2085_v10 }
  0x19   :  { %503 = vmatpush1.msra.mxu1 %v2093_v12  ;;  %679 = vmatpush1.msra.mxu0 %v2093_v12 }
  0x1a   :  { %504 = vmatprep.subr.mxu1 %v2102_v14  ;;  %1752 = vmatmul.mubr.msk.f32.gmra.mxu0 %vm60_vm0, %v36_v30 }
  0x1b   :  { %505 = vmatpush1.msra.mxu1 %v2111_v16  ;;  %179 = vmatprep.mubr.f32.mxu0 %v1986_v3 }
  0x1c   :  { %506 = vmatprep.subr.mxu1 %v2120_v18  ;;  %680 = vmatprep.subr.mxu0 %v2102_v14 }
  0x1d   :  { %507 = vmatpush1.msra.mxu1 %v2126_v19  ;;  %681 = vmatpush1.msra.mxu0 %v2111_v16 }
  0x1e   :  { %508 = vmatprep.subr.mxu1 %v2132_v20  ;;  %1753 = vmatmul.mubr.msk.f32.gmra.mxu0 %vm60_vm0, %v37_v31 }
  0x1f   :  { %509 = vmatpush1.msra.mxu1 %v2139_v21  ;;  %185 = vmatprep.mubr.f32.mxu0 %v1986_v3 }
  0x20   :  { %510 = vmatprep.subr.mxu1 %v2149_v23  ;;  %682 = vmatprep.subr.mxu0 %v2120_v18 }
  0x21   :  { %511 = vmatpush1.msra.mxu1 %v2160_v25  ;;  %683 = vmatpush1.msra.mxu0 %v2126_v19 }
  0x22   :  { %512 = vmatprep.subr.mxu1 %v2168_v26  ;;  %1754 = vmatmul.mubr.msk.f32.gmra.mxu0 %vm60_vm0, %v38_v32 }
  0x23   :  { %513 = vmatpush1.msra.mxu1 %v2176_v27  ;;  %191 = vmatprep.mubr.f32.mxu0 %v1986_v3 }
  0x24   :  { %684 = vmatprep.subr.mxu0 %v2132_v20  ;;  %850 = vmatprep.subr.mxu1 %v2048_v1 }
  0x25   :  { %685 = vmatpush1.msra.mxu0 %v2139_v21  ;;  %1838 = vset.pattern.permute.xlu0 %v1990_v37 }
  0x26   :  { %686 = vmatprep.subr.mxu0 %v2149_v23  ;;  %1755 = vmatmul.mubr.msk.f32.gmra.mxu0 %vm60_vm0, %v39_v33 }
  0x27   :  { %687 = vmatpush1.msra.mxu0 %v2160_v25  ;;  %722 = vmatprep.mubr.f32.mxu0 %v1986_v3 }
  0x28   :  { %688 = vmatprep.subr.mxu0 %v2168_v26  ;;  %1839 = vset.pattern.permute.xlu1 %v1990_v37 }
  0x29   :  { %689 = vmatpush1.msra.mxu0 %v2176_v27 }
  0x2a   :  { %1026 = vmatprep.subr.mxu0 %v2048_v1 }
  0x7e   :  { %v2258_v48 = vpop.permute.xlu0 %387 }
  0xca   :  { %v151_v40 = vpop.f32.mrf.mxu0 }
  0xcb   :  { %v2250_v41 = vadd.f32 %v151_v40, %v53_v38 }
  0xcc   :  { %v153_v43 = vpop.f32.mrf.mxu0 }
  0xcd   :  { %199 = vst.msk [vmem:[#allocation2] sm:$0xff] %vm198_vm1, %v2250_v41  ;;  %v2254_v44 = vadd.f32 %v153_v43, %v57_v42 }
  0xce   :  { %v157_v45 = vpop.f32.mrf.mxu0 }
  0xcf   :  { %v2256_v46 = vadd.f32 %v157_v45, %v53_v38 }
  0xd0   :  { %v159_v47 = vpop.f32.mrf.mxu0 }
  0xd1   :  { %200 = vst.msk [vmem:[#allocation2 + $0x8] sm:$0xff] %vm198_vm1, %v2256_v46  ;;  %v2262_v49 = vadd.f32 %v159_v47, %v57_v42 }
  0xd2   :  { %v163_v50 = vpop.f32.mrf.mxu0 }
  0xd3   :  { %v375_v51 = vpop.f32.mrf.mxu1  ;;  %v2264_v52 = vadd.f32 %v163_v50, %v53_v38 }
  0xd4   :  { %v390_v53 = vadd.f32 %v2258_v48, %v375_v51  ;;  %v165_v54 = vpop.f32.mrf.mxu0  ;;  %v302_v32 = vld [vmem:[#allocation2] sm:$0xff] }
  0xd5   :  { %201 = vst.msk [vmem:[#allocation2 + $0x10] sm:$0xff] %vm198_vm1, %v2264_v52  ;;  %v2269_v55 = vadd.f32 %v165_v54, %v57_v42  ;;  %v377_v30 = vpop.f32.mrf.mxu1  ;;  %v380_v33 = vadd.f32 %v375_v51, %v302_v32 }
  0xd6   :  { %392 = vrot.lane.b32.xlu0 %v390_v53, %s1987_s16  ;;  %v169_v56 = vpop.f32.mrf.mxu0  ;;  %v432_v31 = vadd.f32 %v2154_v24, %v377_v30 }
  0xd7   :  { %v2272_v57 = vadd.f32 %v169_v56, %v53_v38  ;;  %v1757_v34 = vmul.f32 -1.442695, %v380_v33 }
  0xd8   :  { %v171_v58 = vpop.f32.mrf.mxu0 }
  0xd9   :  { %202 = vst.msk [vmem:[#allocation2 + $0x18] sm:$0xff] %vm198_vm1, %v2272_v57  ;;  %v2276_v59 = vadd.f32 %v171_v58, %v57_v42  ;;  %1840 = vpow2.f32 %v1757_v34 }
  0xda   :  { %411 = vrot.lane.b32.xlu0 %v375_v51, %s1988_s3  ;;  %v175_v60 = vpop.f32.mrf.mxu0 }
  0xdb   :  { %v2279_v61 = vadd.f32 %v175_v60, %v53_v38 }
  0xdc   :  { %v177_v62 = vpop.f32.mrf.mxu0 }
  0xdd   :  { %203 = vst.msk [vmem:[#allocation2 + $0x20] sm:$0xff] %vm198_vm1, %v2279_v61  ;;  %v2283_v63 = vadd.f32 %v177_v62, %v57_v42 }
  0xde   :  { %v181_v0 = vpop.f32.mrf.mxu0 }
  0xdf   :  { %v2285_v2 = vadd.f32 %v181_v0, %v53_v38 }
  0xe0   :  { %v183_v5 = vpop.f32.mrf.mxu0 }
  0xe1   :  { %204 = vst.msk [vmem:[#allocation2 + $0x28] sm:$0xff] %vm198_vm1, %v2285_v2  ;;  %v2289_v7 = vadd.f32 %v183_v5, %v57_v42 }
  0xe2   :  { %v187_v9 = vpop.f32.mrf.mxu0 }
  0xe3   :  { %v2291_v11 = vadd.f32 %v187_v9, %v53_v38 }
  0xe4   :  { %v189_v13 = vpop.f32.mrf.mxu0 }
  0xe5   :  { %205 = vst.msk [vmem:[#allocation2 + $0x30] sm:$0xff] %vm198_vm1, %v2291_v11  ;;  %v2295_v15 = vadd.f32 %v189_v13, %v57_v42 }
  0xe6   :  { %v193_v17 = vpop.f32.mrf.mxu0  ;;  %v1841_v35 = vpop.eup %1840 }
  0xe7   :  { %v194_v22 = vadd.f32 %v193_v17, %v53_v38  ;;  %v384_v36 = vadd.f32 1.0, %v1841_v35  ;;  %v2307_v38 = vld [vmem:[%s2943_s1] sm:$0xff] }
  0xe8   :  { %v195_v28 = vpop.f32.mrf.mxu0  ;;  %vm452_vm2 = vcmp.gt.s32.totalorder %v2307_v38, 0  ;;  %vm453_vm3 = vcmp.gt.s32.totalorder %v2307_v38, 7  ;;  %vm622_vm8 = vcmp.gt.s32.totalorder %v2307_v38, 1  ;;  %vm623_vm9 = vcmp.gt.s32.totalorder %v2307_v38, 6 }
  0xe9   :  { %206 = vst.msk [vmem:[#allocation2 + $0x38] sm:$0xff] %vm198_vm1, %v194_v22  ;;  %251 = vrot.lane.b32.xlu1 %v194_v22, %s1988_s3  ;;  %v196_v29 = vadd.f32 %v195_v28, %v57_v42  ;;  %1842 = vrcp.f32 %v384_v36  ;;  %v454_v43 = vsel %vm452_vm2, 1, %v1990_v37  ;;  %v465_v45 = vsel %vm453_vm3, 1, %v1990_v37 }
  0xea   :  { %vm798_vm12 = vcmp.gt.s32.totalorder %v2307_v38, 2  ;;  %vm799_vm13 = vcmp.gt.s32.totalorder %v2307_v38, 5  ;;  %vm974_vm2 = vcmp.gt.s32.totalorder %v2307_v38, 3  ;;  %vm975_vm3 = vcmp.gt.s32.totalorder %v2307_v38, 4 }
  0xed   :  { %253 = vrot.lane.b32.xlu1 %v196_v29, %s1988_s3 }
  0xf1   :  { %434 = vrot.lane.b32.xlu1 %v432_v31, %s1989_s12 }
  0xf6   :  { %v1843_v39 = vpop.eup %1842 }
  0xf7   :  { %v402_v33 = vsub.f32 1.0, %v1843_v39  ;;  %v408_v36 = vmul.f32 0.0, %v1843_v39 }
 0x148   :  { %v393_v40 = vpop.permute.xlu0 %392 }
 0x149   :  { %v395_v42 = vmul.f32 %v1843_v39, %v393_v40 }
 0x14b   :  { %397 = vrot.lane.b32.xlu0 %v395_v42, %s1987_s16 }
 0x14c   :  { %v412_v53 = vpop.permute.xlu0 %411 }
 0x14f   :  { %456 = vperm.xlu0 %1838, %v454_v43  }
 0x153   :  { %467 = vperm.xlu0 %1838, %v465_v45  }
 0x15b   :  { %v252_v47 = vpop.permute.xlu1 %251 }
 0x15f   :  { %v254_v50 = vpop.permute.xlu1 %253 }
 0x160   :  { %v262_v51 = vsel %vm60_vm0, %v252_v47, %v254_v50 }
 0x161   :  { %278 = vst.msk [vmem:[#allocation3 + $0x38] sm:$0xff] %vm198_vm1, %v262_v51 }
 0x163   :  { %v435_v5 = vpop.permute.xlu1 %434 }
 0x168   :  { %v304_v54 = vld [vmem:[#allocation3 + $0x38] sm:$0xff] }
 0x169   :  { %v414_v56 = vadd.f32 %v412_v53, %v304_v54 }
 0x16b   :  { %v1758_v58 = vmul.f32 -1.442695, %v414_v56 }
 0x16d   :  { %1844 = vpow2.f32 %v1758_v58 }
 0x17a   :  { %v1845_v60 = vpop.eup %1844 }
 0x17b   :  { %v418_v62 = vadd.f32 1.0, %v1845_v60 }
 0x17d   :  { %1846 = vrcp.f32 %v418_v62 }
 0x18a   :  { %v1847_v0 = vpop.eup %1846 }
 0x18b   :  { %v437_v9 = vmul.f32 %v1847_v0, %v435_v5 }
 0x18d   :  { %439 = vrot.lane.b32.xlu1 %v437_v9, %s1987_s16 }
 0x1bd   :  { %v398_v13 = vpop.permute.xlu0 %397 }
 0x1be   :  { %v400_v17 = vadd.f32 %v398_v13, %v302_v32 }
 0x1c0   :  { %1848 = vtanh.f32 %v400_v17 }
 0x1ca   :  { %v2320_v35 = vpop.permute.xlu0 %456 }
 0x1cb   :  { %vm458_vm4 = vcmp.eq.s32.totalorder %v2320_v35, 1 }
 0x1cd   :  { %v1849_v22 = vpop.eup %1848 }
 0x1ce   :  { %404 = vrot.lane.b32.xlu1 %v1849_v22, %s1989_s12  ;;  %v2331_v56 = vpop.permute.xlu0 %467  ;;  %v475_v22 = vld [vmem:[#allocation2 + $0x8] sm:$0xff] }
 0x1cf   :  { %vm469_vm6 = vcmp.eq.s32.totalorder %v2331_v56, 1 }
 0x1d2   :  { %422 = vrot.lane.b32.xlu1 %v377_v30, %s1988_s3 }
 0x1ff   :  { %v440_v28 = vpop.permute.xlu1 %439 }
 0x200   :  { %v442_v29 = vadd.f32 %v440_v28, %v304_v54 }
 0x202   :  { %1850 = vtanh.f32 %v442_v29 }
 0x20f   :  { %v1851_v31 = vpop.eup %1850 }
 0x210   :  { %446 = vrot.lane.b32.xlu1 %v1851_v31, %s1989_s12 }
 0x240   :  { %v405_v34 = vpop.permute.xlu1 %404 }
 0x241   :  { %v407_v40 = vmul.f32 %v405_v34, %v402_v33 }
 0x243   :  { %v409_v32 = vadd.f32 %v408_v36, %v407_v40 }
 0x244   :  { %v423_v30 = vpop.permute.xlu1 %422 }
 0x245   :  { %v2325_v42 = vsel %vm458_vm4, %v409_v32, 0.0  ;;  %v425_v43 = vadd.f32 %v423_v30, %v304_v54  ;;  %v624_v30 = vsel %vm622_vm8, 1, %v1990_v37 }
 0x246   :  { %461 = vrot.lane.b32.xlu0 %v2325_v42, %s1989_s12 }
 0x247   :  { %v1759_v45 = vmul.f32 -1.442695, %v425_v43 }
 0x249   :  { %1852 = vpow2.f32 %v1759_v45 }
 0x24a   :  { %247 = vrot.lane.b32.xlu0 %v2291_v11, %s1988_s3 }
 0x256   :  { %v1853_v47 = vpop.eup %1852 }
 0x257   :  { %v429_v39 = vadd.f32 1.0, %v1853_v47 }
 0x259   :  { %1854 = vrcp.f32 %v429_v39 }
 0x266   :  { %v1855_v50 = vpop.eup %1854 }
 0x267   :  { %v444_v51 = vsub.f32 1.0, %v1855_v50  ;;  %v450_v58 = vmul.f32 0.0, %v1855_v50 }
 0x282   :  { %v447_v53 = vpop.permute.xlu1 %446 }
 0x283   :  { %v449_v60 = vmul.f32 %v447_v53, %v444_v51 }
 0x285   :  { %v451_v62 = vadd.f32 %v450_v58, %v449_v60 }
 0x287   :  { %v2336_v11 = vsel %vm469_vm6, %v451_v62, 0.0 }
 0x288   :  { %1760 = vst.msk [vmem:[%s2944_s8 + $0x38] sm:$0xff] %vm472_vm5, %v2336_v11 }
 0x2b8   :  { %v462_v54 = vpop.permute.xlu0 %461 }
 0x2b9   :  { %464 = vst.msk [vmem:[%s2944_s8] sm:$0xff] %vm60_vm0, %v462_v54  ;;  %v478_v0 = vsel %vm60_vm0, %v462_v54, %v2336_v11 }
 0x2ba   :  { %1761 = vmatmul.mubr.msk.f32.vlgmr.msra.gmra.mxu1 %vm305_vm7, %v478_v0 }
 0x2bb   :  { %851 = vmatpush1.msra.mxu1 %v2059_v4  ;;  %898 = vmatprep.mubr.f32.mxu1 %v1986_v3 }
 0x2bc   :  { %852 = vmatprep.subr.mxu1 %v2067_v6  ;;  %v248_v32 = vpop.permute.xlu0 %247 }
 0x2bd   :  { %853 = vmatpush1.msra.mxu1 %v2076_v8 }
 0x2be   :  { %854 = vmatprep.subr.mxu1 %v2085_v10 }
 0x2bf   :  { %855 = vmatpush1.msra.mxu1 %v2093_v12 }
 0x2c0   :  { %856 = vmatprep.subr.mxu1 %v2102_v14 }
 0x2c1   :  { %857 = vmatpush1.msra.mxu1 %v2111_v16 }
 0x2c2   :  { %858 = vmatprep.subr.mxu1 %v2120_v18 }
 0x2c3   :  { %859 = vmatpush1.msra.mxu1 %v2126_v19 }
 0x2c4   :  { %860 = vmatprep.subr.mxu1 %v2132_v20 }
 0x2c5   :  { %861 = vmatpush1.msra.mxu1 %v2139_v21 }
 0x2c6   :  { %862 = vmatprep.subr.mxu1 %v2149_v23 }
 0x2c7   :  { %863 = vmatpush1.msra.mxu1 %v2160_v25 }
 0x2c8   :  { %864 = vmatprep.subr.mxu1 %v2168_v26 }
 0x2c9   :  { %865 = vmatpush1.msra.mxu1 %v2176_v27 }
 0x2ca   :  { %1188 = vmatprep.subr.mxu1 %v2048_v1 }
 0x37a   :  { %v548_v5 = vpop.f32.mrf.mxu1 }
 0x37b   :  { %v560_v9 = vadd.f32 %v548_v5, %v2258_v48  ;;  %581 = vrot.lane.b32.xlu0 %v548_v5, %s1988_s3  ;;  %v553_v28 = vadd.f32 %v548_v5, %v475_v22 }
 0x37c   :  { %v550_v13 = vpop.f32.mrf.mxu1 }
 0x37d   :  { %562 = vrot.lane.b32.xlu1 %v560_v9, %s1987_s16  ;;  %v602_v17 = vadd.f32 %v2154_v24, %v550_v13  ;;  %v1762_v29 = vmul.f32 -1.442695, %v553_v28  ;;  %v636_v9 = vsel %vm623_vm9, 1, %v1990_v37 }
 0x37f   :  { %1856 = vpow2.f32 %v1762_v29 }
 0x381   :  { %249 = vrot.lane.b32.xlu1 %v2295_v15, %s1988_s3 }
 0x385   :  { %604 = vrot.lane.b32.xlu1 %v602_v17, %s1989_s12 }
 0x38c   :  { %v1857_v31 = vpop.eup %1856 }
 0x38d   :  { %v557_v33 = vadd.f32 1.0, %v1857_v31 }
 0x38f   :  { %1858 = vrcp.f32 %v557_v33 }
 0x39c   :  { %v1859_v34 = vpop.eup %1858 }
 0x39d   :  { %v572_v33 = vsub.f32 1.0, %v1859_v34 }
 0x3ed   :  { %v582_v45 = vpop.permute.xlu0 %581 }
 0x3ef   :  { %v563_v36 = vpop.permute.xlu1 %562 }
 0x3f0   :  { %v565_v40 = vmul.f32 %v1859_v34, %v563_v36  ;;  %v578_v36 = vmul.f32 %v1859_v34, %v2325_v42 }
 0x3f2   :  { %567 = vrot.lane.b32.xlu0 %v565_v40, %s1987_s16 }
 0x3f3   :  { %v250_v15 = vpop.permute.xlu1 %249 }
 0x3f4   :  { %v261_v43 = vsel %vm60_vm0, %v248_v32, %v250_v15 }
 0x3f5   :  { %277 = vst.msk [vmem:[#allocation3 + $0x30] sm:$0xff] %vm198_vm1, %v261_v43 }
 0x3f6   :  { %626 = vperm.xlu0 %1838, %v624_v30  }
 0x3f7   :  { %v605_v60 = vpop.permute.xlu1 %604 }
 0x3fa   :  { %592 = vrot.lane.b32.xlu0 %v550_v13, %s1988_s3 }
 0x3fc   :  { %v477_v47 = vld [vmem:[#allocation3 + $0x30] sm:$0xff] }
 0x3fd   :  { %v584_v39 = vadd.f32 %v582_v45, %v477_v47 }
 0x3ff   :  { %v1763_v50 = vmul.f32 -1.442695, %v584_v39 }
 0x401   :  { %1860 = vpow2.f32 %v1763_v50 }
 0x40e   :  { %v1861_v51 = vpop.eup %1860 }
 0x40f   :  { %v588_v53 = vadd.f32 1.0, %v1861_v51 }
 0x411   :  { %1862 = vrcp.f32 %v588_v53 }
 0x41e   :  { %v1863_v58 = vpop.eup %1862 }
 0x41f   :  { %v607_v62 = vmul.f32 %v1863_v58, %v605_v60 }
 0x421   :  { %609 = vrot.lane.b32.xlu1 %v607_v62, %s1987_s16 }
 0x464   :  { %v568_v54 = vpop.permute.xlu0 %567 }
 0x465   :  { %v570_v0 = vadd.f32 %v568_v54, %v475_v22 }
 0x467   :  { %1864 = vtanh.f32 %v570_v0 }
 0x471   :  { %v2385_v29 = vpop.permute.xlu0 %626 }
 0x472   :  { %vm628_vm10 = vcmp.eq.s32.totalorder %v2385_v29, 1 }
 0x474   :  { %v1865_v5 = vpop.eup %1864 }
 0x475   :  { %574 = vrot.lane.b32.xlu1 %v1865_v5, %s1989_s12  ;;  %v593_v31 = vpop.permute.xlu0 %592 }
 0x476   :  { %v595_v32 = vadd.f32 %v593_v31, %v477_v47 }
 0x478   :  { %v1764_v43 = vmul.f32 -1.442695, %v595_v32 }
 0x479   :  { %638 = vperm.xlu1 %1839, %v636_v9  }
 0x493   :  { %v610_v13 = vpop.permute.xlu1 %609 }
 0x494   :  { %v612_v17 = vadd.f32 %v610_v13, %v477_v47  ;;  %v647_v13 = vld [vmem:[#allocation2 + $0x10] sm:$0xff] }
 0x496   :  { %1866 = vtanh.f32 %v612_v17 }
 0x497   :  { %1868 = vpow2.f32 %v1764_v43  ;;  %v800_v43 = vsel %vm798_vm12, 1, %v1990_v37 }
 0x4a3   :  { %v1867_v28 = vpop.eup %1866 }
 0x4a4   :  { %616 = vrot.lane.b32.xlu0 %v1867_v28, %s1989_s12  ;;  %v1869_v34 = vpop.eup %1868 }
 0x4a5   :  { %v599_v45 = vadd.f32 1.0, %v1869_v34 }
 0x4a7   :  { %1870 = vrcp.f32 %v599_v45 }
 0x4b4   :  { %v1871_v47 = vpop.eup %1870 }
 0x4b5   :  { %v614_v39 = vsub.f32 1.0, %v1871_v47  ;;  %v620_v53 = vmul.f32 %v1871_v47, %v2336_v11 }
 0x4e7   :  { %v575_v22 = vpop.permute.xlu1 %574 }
 0x4e8   :  { %v577_v40 = vmul.f32 %v575_v22, %v572_v33 }
 0x4ea   :  { %v2388_v15 = vadd.f32 %v578_v36, %v577_v40 }
 0x4ec   :  { %v2395_v30 = vsel %vm628_vm10, %v2388_v15, %v2325_v42 }
 0x4ed   :  { %651 = vrot.lane.b32.xlu1 %v2395_v30, %s1989_s12 }
 0x4f1   :  { %243 = vrot.lane.b32.xlu1 %v2285_v2, %s1988_s3 }
 0x4f4   :  { %v2401_v50 = vpop.permute.xlu1 %638 }
 0x4f5   :  { %vm640_vm11 = vcmp.eq.s32.totalorder %v2401_v50, 1 }
 0x516   :  { %v617_v51 = vpop.permute.xlu0 %616 }
 0x517   :  { %v619_v42 = vmul.f32 %v617_v51, %v614_v39 }
 0x519   :  { %v621_v58 = vadd.f32 %v620_v53, %v619_v42 }
 0x51b   :  { %v641_v60 = vsel %vm640_vm11, %v621_v58, 0.0  ;;  %v2414_v62 = vsel %vm640_vm11, %v621_v58, %v2336_v11 }
 0x51c   :  { %1766 = vst.msk [vmem:[%s2944_s8 + $0x30] sm:$0xff] %vm472_vm5, %v641_v60 }
 0x55f   :  { %v652_v2 = vpop.permute.xlu1 %651 }
 0x560   :  { %v654_v54 = vsel %vm60_vm0, %v652_v2, %v2414_v62 }
 0x561   :  { %1767 = vmatmul.mubr.msk.f32.vlgmr.msra.gmra.mxu0 %vm305_vm7, %v654_v54 }
 0x562   :  { %1027 = vmatpush1.msra.mxu0 %v2059_v4  ;;  %1074 = vmatprep.mubr.f32.mxu0 %v1986_v3 }
 0x563   :  { %1028 = vmatprep.subr.mxu0 %v2067_v6  ;;  %v244_v32 = vpop.permute.xlu1 %243 }
 0x564   :  { %1029 = vmatpush1.msra.mxu0 %v2076_v8 }
 0x565   :  { %1030 = vmatprep.subr.mxu0 %v2085_v10 }
 0x566   :  { %1031 = vmatpush1.msra.mxu0 %v2093_v12 }
 0x567   :  { %1032 = vmatprep.subr.mxu0 %v2102_v14 }
 0x568   :  { %1033 = vmatpush1.msra.mxu0 %v2111_v16 }
 0x569   :  { %1034 = vmatprep.subr.mxu0 %v2120_v18 }
 0x56a   :  { %1035 = vmatpush1.msra.mxu0 %v2126_v19 }
 0x56b   :  { %1036 = vmatprep.subr.mxu0 %v2132_v20 }
 0x56c   :  { %1037 = vmatpush1.msra.mxu0 %v2139_v21 }
 0x56d   :  { %1038 = vmatprep.subr.mxu0 %v2149_v23 }
 0x56e   :  { %1039 = vmatpush1.msra.mxu0 %v2160_v25 }
 0x56f   :  { %1040 = vmatprep.subr.mxu0 %v2168_v26 }
 0x570   :  { %1041 = vmatpush1.msra.mxu0 %v2176_v27 }
 0x571   :  { %1350 = vmatprep.subr.mxu0 %v2048_v1 }
 0x621   :  { %v724_v11 = vpop.f32.mrf.mxu0 }
 0x622   :  { %v736_v0 = vadd.f32 %v724_v11, %v2258_v48  ;;  %757 = vrot.lane.b32.xlu1 %v724_v11, %s1988_s3  ;;  %v729_v17 = vadd.f32 %v724_v11, %v647_v13 }
 0x623   :  { %v726_v5 = vpop.f32.mrf.mxu0 }
 0x624   :  { %738 = vrot.lane.b32.xlu0 %v736_v0, %s1987_s16  ;;  %v778_v9 = vadd.f32 %v2154_v24, %v726_v5  ;;  %v1768_v28 = vmul.f32 -1.442695, %v729_v17 }
 0x626   :  { %1872 = vpow2.f32 %v1768_v28 }
 0x628   :  { %245 = vrot.lane.b32.xlu0 %v2289_v7, %s1988_s3 }
 0x62c   :  { %780 = vrot.lane.b32.xlu0 %v778_v9, %s1989_s12 }
 0x633   :  { %v1873_v31 = vpop.eup %1872 }
 0x634   :  { %v733_v33 = vadd.f32 1.0, %v1873_v31 }
 0x636   :  { %1874 = vrcp.f32 %v733_v33 }
 0x643   :  { %v1875_v22 = vpop.eup %1874 }
 0x694   :  { %v758_v45 = vpop.permute.xlu1 %757 }
 0x696   :  { %v739_v36 = vpop.permute.xlu0 %738 }
 0x697   :  { %v741_v40 = vmul.f32 %v1875_v22, %v739_v36  ;;  %v748_v36 = vsub.f32 1.0, %v1875_v22 }
 0x699   :  { %743 = vrot.lane.b32.xlu1 %v741_v40, %s1987_s16  ;;  %v754_v40 = vmul.f32 %v1875_v22, %v2395_v30 }
 0x69a   :  { %v246_v7 = vpop.permute.xlu0 %245 }
 0x69b   :  { %v260_v34 = vsel %vm60_vm0, %v244_v32, %v246_v7 }
 0x69c   :  { %276 = vst.msk [vmem:[#allocation3 + $0x28] sm:$0xff] %vm198_vm1, %v260_v34 }
 0x69d   :  { %802 = vperm.xlu1 %1839, %v800_v43  }
 0x69e   :  { %v781_v60 = vpop.permute.xlu0 %780 }
 0x6a1   :  { %768 = vrot.lane.b32.xlu1 %v726_v5, %s1988_s3  ;;  %v812_v5 = vsel %vm799_vm13, 1, %v1990_v37 }
 0x6a3   :  { %v649_v47 = vld [vmem:[#allocation3 + $0x28] sm:$0xff] }
 0x6a4   :  { %v760_v39 = vadd.f32 %v758_v45, %v649_v47 }
 0x6a6   :  { %v1769_v51 = vmul.f32 -1.442695, %v760_v39 }
 0x6a8   :  { %1876 = vpow2.f32 %v1769_v51 }
 0x6b5   :  { %v1877_v53 = vpop.eup %1876 }
 0x6b6   :  { %v764_v42 = vadd.f32 1.0, %v1877_v53 }
 0x6b8   :  { %1878 = vrcp.f32 %v764_v42 }
 0x6c5   :  { %v1879_v58 = vpop.eup %1878 }
 0x6c6   :  { %v783_v2 = vmul.f32 %v1879_v58, %v781_v60 }
 0x6c8   :  { %785 = vrot.lane.b32.xlu0 %v783_v2, %s1987_s16 }
 0x70b   :  { %v744_v54 = vpop.permute.xlu1 %743 }
 0x70c   :  { %v746_v11 = vadd.f32 %v744_v54, %v647_v13 }
 0x70e   :  { %1880 = vtanh.f32 %v746_v11 }
 0x718   :  { %v2454_v31 = vpop.permute.xlu1 %802 }
 0x719   :  { %vm804_vm14 = vcmp.eq.s32.totalorder %v2454_v31, 1  ;;  %v1802_v31 = vld [vmem:[%s2946_s7] ss:$0 sm:$0xff] }
 0x71b   :  { %v1881_v0 = vpop.eup %1880 }
 0x71c   :  { %750 = vrot.lane.b32.xlu0 %v1881_v0, %s1989_s12  ;;  %v769_v33 = vpop.permute.xlu1 %768 }
 0x71d   :  { %v771_v7 = vadd.f32 %v769_v33, %v649_v47 }
 0x71f   :  { %v1770_v45 = vmul.f32 -1.442695, %v771_v7 }
 0x720   :  { %814 = vperm.xlu0 %1838, %v812_v5  }
 0x73a   :  { %v786_v9 = vpop.permute.xlu0 %785 }
 0x73b   :  { %v788_v17 = vadd.f32 %v786_v9, %v649_v47 }
 0x73d   :  { %1882 = vtanh.f32 %v788_v17 }
 0x73e   :  { %1884 = vpow2.f32 %v1770_v45 }
 0x74a   :  { %v1883_v28 = vpop.eup %1882 }
 0x74b   :  { %792 = vrot.lane.b32.xlu1 %v1883_v28, %s1989_s12  ;;  %v1885_v22 = vpop.eup %1884 }
 0x74c   :  { %v775_v47 = vadd.f32 1.0, %v1885_v22 }
 0x74e   :  { %1886 = vrcp.f32 %v775_v47 }
 0x75b   :  { %v1887_v39 = vpop.eup %1886 }
 0x75c   :  { %v790_v51 = vsub.f32 1.0, %v1887_v39  ;;  %v796_v58 = vmul.f32 %v1887_v39, %v2414_v62 }
 0x78e   :  { %v751_v13 = vpop.permute.xlu0 %750 }
 0x78f   :  { %v753_v32 = vmul.f32 %v751_v13, %v748_v36 }
 0x791   :  { %v2457_v43 = vadd.f32 %v754_v40, %v753_v32  ;;  %v988_v32 = vsel %vm975_vm3, 1, %v1990_v37 }
 0x793   :  { %v2464_v34 = vsel %vm804_vm14, %v2457_v43, %v2395_v30 }
 0x794   :  { %827 = vrot.lane.b32.xlu0 %v2464_v34, %s1989_s12 }
 0x798   :  { %239 = vrot.lane.b32.xlu0 %v2279_v61, %s1988_s3 }
 0x79b   :  { %v2470_v42 = vpop.permute.xlu0 %814 }
 0x79c   :  { %vm816_vm15 = vcmp.eq.s32.totalorder %v2470_v42, 1 }
 0x7bd   :  { %v793_v53 = vpop.permute.xlu1 %792 }
 0x7be   :  { %v795_v30 = vmul.f32 %v793_v53, %v790_v51 }
 0x7c0   :  { %v797_v60 = vadd.f32 %v796_v58, %v795_v30 }
 0x7c2   :  { %v817_v2 = vsel %vm816_vm15, %v797_v60, 0.0  ;;  %v2483_v61 = vsel %vm816_vm15, %v797_v60, %v2414_v62 }
 0x7c3   :  { %1772 = vst.msk [vmem:[%s2944_s8 + $0x28] sm:$0xff] %vm472_vm5, %v817_v2 }
 0x806   :  { %v828_v54 = vpop.permute.xlu0 %827 }
 0x807   :  { %v830_v11 = vsel %vm60_vm0, %v828_v54, %v2483_v61 }
 0x808   :  { %1773 = vmatmul.mubr.msk.f32.vlgmr.msra.gmra.mxu1 %vm305_vm7, %v830_v11 }
 0x809   :  { %1189 = vmatpush1.msra.mxu1 %v2059_v4  ;;  %1236 = vmatprep.mubr.f32.mxu1 %v1986_v3 }
 0x80a   :  { %1190 = vmatprep.subr.mxu1 %v2067_v6 }
 0x80b   :  { %1191 = vmatpush1.msra.mxu1 %v2076_v8 }
 0x80c   :  { %1192 = vmatprep.subr.mxu1 %v2085_v10 }
 0x80d   :  { %1193 = vmatpush1.msra.mxu1 %v2093_v12  ;;  %v823_v12 = vld [vmem:[#allocation2 + $0x18] sm:$0xff] }
 0x80e   :  { %1194 = vmatprep.subr.mxu1 %v2102_v14 }
 0x80f   :  { %1195 = vmatpush1.msra.mxu1 %v2111_v16 }
 0x810   :  { %1196 = vmatprep.subr.mxu1 %v2120_v18 }
 0x811   :  { %1197 = vmatpush1.msra.mxu1 %v2126_v19 }
 0x812   :  { %1198 = vmatprep.subr.mxu1 %v2132_v20 }
 0x813   :  { %1199 = vmatpush1.msra.mxu1 %v2139_v21 }
 0x814   :  { %1200 = vmatprep.subr.mxu1 %v2149_v23  ;;  %v240_v23 = vpop.permute.xlu0 %239 }
 0x815   :  { %1201 = vmatpush1.msra.mxu1 %v2160_v25 }
 0x816   :  { %1202 = vmatprep.subr.mxu1 %v2168_v26 }
 0x817   :  { %1203 = vmatpush1.msra.mxu1 %v2176_v27 }
 0x818   :  { %1511 = vmatprep.subr.mxu1 %v2048_v1 }
 0x8c8   :  { %v900_v4 = vpop.f32.mrf.mxu1 }
 0x8c9   :  { %v912_v6 = vadd.f32 %v900_v4, %v2258_v48  ;;  %933 = vrot.lane.b32.xlu0 %v900_v4, %s1988_s3  ;;  %v905_v14 = vadd.f32 %v900_v4, %v823_v12 }
 0x8ca   :  { %v902_v8 = vpop.f32.mrf.mxu1 }
 0x8cb   :  { %914 = vrot.lane.b32.xlu1 %v912_v6, %s1987_s16  ;;  %v954_v10 = vadd.f32 %v2154_v24, %v902_v8  ;;  %v1774_v16 = vmul.f32 -1.442695, %v905_v14  ;;  %v976_v24 = vsel %vm974_vm2, 1, %v1990_v37 }
 0x8cd   :  { %1888 = vpow2.f32 %v1774_v16 }
 0x8cf   :  { %241 = vrot.lane.b32.xlu1 %v2283_v63, %s1988_s3 }
 0x8d3   :  { %956 = vrot.lane.b32.xlu1 %v954_v10, %s1989_s12 }
 0x8da   :  { %v1889_v1 = vpop.eup %1888 }
 0x8db   :  { %v909_v18 = vadd.f32 1.0, %v1889_v1 }
 0x8dd   :  { %1890 = vrcp.f32 %v909_v18 }
 0x8ea   :  { %v1891_v19 = vpop.eup %1890 }
 0x8eb   :  { %v924_v51 = vsub.f32 1.0, %v1891_v19  ;;  %v930_v58 = vmul.f32 %v1891_v19, %v2464_v34 }
 0x93b   :  { %v934_v27 = vpop.permute.xlu0 %933 }
 0x93d   :  { %v915_v20 = vpop.permute.xlu1 %914 }
 0x93e   :  { %v917_v21 = vmul.f32 %v1891_v19, %v915_v20  ;;  %v2560_v19 = vld [vmem:[%s2939_s4 + $0x70] sm:$0xff]  ;;  %v2567_v20 = vld [vmem:[%s2939_s4 + $0x68] sm:$0xff] }
 0x940   :  { %919 = vrot.lane.b32.xlu0 %v917_v21, %s1987_s16  ;;  %v2579_v21 = vld [vmem:[%s2939_s4 + $0x58] sm:$0xff] }
 0x941   :  { %v242_v25 = vpop.permute.xlu1 %241 }
 0x942   :  { %v259_v26 = vsel %vm60_vm0, %v240_v23, %v242_v25  ;;  %v2585_v23 = vld [vmem:[%s2939_s4 + $0x50] sm:$0xff]  ;;  %v2591_v25 = vld [vmem:[%s2939_s4 + $0x48] sm:$0xff] }
 0x943   :  { %275 = vst.msk [vmem:[#allocation3 + $0x20] sm:$0xff] %vm198_vm1, %v259_v26  ;;  %v2603_v26 = vld [vmem:[%s2939_s4 + $0x38] sm:$0xff] }
 0x944   :  { %978 = vperm.xlu0 %1838, %v976_v24   ;;  %v2597_v24 = vld [vmem:[%s2939_s4 + $0x40] sm:$0xff] }
 0x945   :  { %v957_v28 = vpop.permute.xlu1 %956 }
 0x948   :  { %944 = vrot.lane.b32.xlu0 %v902_v8, %s1988_s3 }
 0x94a   :  { %v825_v63 = vld [vmem:[#allocation3 + $0x20] sm:$0xff] }
 0x94b   :  { %v936_v62 = vadd.f32 %v934_v27, %v825_v63  ;;  %v2609_v27 = vld [vmem:[%s2939_s4 + $0x30] sm:$0xff] }
 0x94d   :  { %v1775_v0 = vmul.f32 -1.442695, %v936_v62  ;;  %v2621_v62 = vld [vmem:[%s2939_s4 + $0x20] sm:$0xff] }
 0x94f   :  { %1892 = vpow2.f32 %v1775_v0  ;;  %v2627_v0 = vld [vmem:[%s2939_s4 + $0x18] sm:$0xff] }
 0x95c   :  { %v1893_v5 = vpop.eup %1892 }
 0x95d   :  { %v940_v9 = vadd.f32 1.0, %v1893_v5  ;;  %v2633_v5 = vld [vmem:[%s2939_s4 + $0x10] sm:$0xff] }
 0x95f   :  { %1894 = vrcp.f32 %v940_v9  ;;  %v2639_v9 = vld [vmem:[%s2939_s4 + $0x8] sm:$0xff] }
 0x96c   :  { %v1895_v17 = vpop.eup %1894 }
 0x96d   :  { %v959_v33 = vmul.f32 %v1895_v17, %v957_v28  ;;  %v2645_v17 = vld [vmem:[%s2939_s4] sm:$0xff] }
 0x96f   :  { %961 = vrot.lane.b32.xlu1 %v959_v33, %s1987_s16 }
 0x9b2   :  { %v920_v36 = vpop.permute.xlu0 %919 }
 0x9b3   :  { %v922_v13 = vadd.f32 %v920_v36, %v823_v12 }
 0x9b5   :  { %1896 = vtanh.f32 %v922_v13  ;;  %v2657_v13 = vld [vmem:[%s2941_s5] ss:$0 sm:$0xff] }
 0x9bf   :  { %v2523_v47 = vpop.permute.xlu0 %978 }
 0x9c0   :  { %vm980_vm8 = vcmp.eq.s32.totalorder %v2523_v47, 1 }
 0x9c2   :  { %v1897_v40 = vpop.eup %1896 }
 0x9c3   :  { %926 = vrot.lane.b32.xlu1 %v1897_v40, %s1989_s12  ;;  %v945_v39 = vpop.permute.xlu0 %944 }
 0x9c4   :  { %v947_v30 = vadd.f32 %v945_v39, %v825_v63 }
 0x9c6   :  { %v1776_v2 = vmul.f32 -1.442695, %v947_v30 }
 0x9c7   :  { %990 = vperm.xlu1 %1839, %v988_v32   ;;  %v999_v32 = vld [vmem:[#allocation2 + $0x20] sm:$0xff] }
 0x9e1   :  { %v962_v7 = vpop.permute.xlu1 %961 }
 0x9e2   :  { %v964_v45 = vadd.f32 %v962_v7, %v825_v63  ;;  %v2615_v63 = vld [vmem:[%s2939_s4 + $0x28] sm:$0xff] }
 0x9e4   :  { %1898 = vtanh.f32 %v964_v45 }
 0x9e5   :  { %1900 = vpow2.f32 %v1776_v2 }
 0x9f1   :  { %v1899_v22 = vpop.eup %1898 }
 0x9f2   :  { %968 = vrot.lane.b32.xlu0 %v1899_v22, %s1989_s12  ;;  %v1901_v54 = vpop.eup %1900 }
 0x9f3   :  { %v951_v11 = vadd.f32 1.0, %v1901_v54 }
 0x9f5   :  { %1902 = vrcp.f32 %v951_v11 }
 0xa02   :  { %v1903_v4 = vpop.eup %1902 }
 0xa03   :  { %v966_v6 = vsub.f32 1.0, %v1903_v4  ;;  %v972_v12 = vmul.f32 %v1903_v4, %v2483_v61 }
 0xa35   :  { %v927_v53 = vpop.permute.xlu1 %926 }
 0xa36   :  { %v929_v38 = vmul.f32 %v927_v53, %v924_v51 }
 0xa38   :  { %v2526_v60 = vadd.f32 %v930_v58, %v929_v38 }
 0xa3a   :  { %v2533_v37 = vsel %vm980_vm8, %v2526_v60, %v2464_v34 }
 0xa3b   :  { %1003 = vrot.lane.b32.xlu1 %v2533_v37, %s1989_s12 }
 0xa3f   :  { %235 = vrot.lane.b32.xlu1 %v2272_v57, %s1988_s3 }
 0xa42   :  { %v2539_v10 = vpop.permute.xlu1 %990 }
 0xa43   :  { %vm992_vm9 = vcmp.eq.s32.totalorder %v2539_v10, 1 }
 0xa64   :  { %v969_v8 = vpop.permute.xlu0 %968 }
 0xa65   :  { %v971_v34 = vmul.f32 %v969_v8, %v966_v6 }
 0xa67   :  { %v973_v14 = vadd.f32 %v972_v12, %v971_v34 }
 0xa69   :  { %v993_v16 = vsel %vm992_vm9, %v973_v14, 0.0  ;;  %v2552_v1 = vsel %vm992_vm9, %v973_v14, %v2483_v61  ;;  %v2573_v61 = vld [vmem:[%s2939_s4 + $0x60] sm:$0xff] }
 0xa6a   :  { %1778 = vst.msk [vmem:[%s2944_s8 + $0x20] sm:$0xff] %vm472_vm5, %v993_v16 }
 0xaad   :  { %v1004_v57 = vpop.permute.xlu1 %1003 }
 0xaae   :  { %v1006_v18 = vsel %vm60_vm0, %v1004_v57, %v2552_v1 }
 0xaaf   :  { %1779 = vmatmul.mubr.msk.f32.vlgmr.msra.gmra.mxu0 %vm305_vm7, %v1006_v18 }
 0xab0   :  { %1351 = vmatpush1.msra.mxu0 %v2560_v19  ;;  %1398 = vmatprep.mubr.f32.mxu0 %v1986_v3 }
 0xab1   :  { %1352 = vmatprep.subr.mxu0 %v2567_v20 }
 0xab2   :  { %1353 = vmatpush1.msra.mxu0 %v2573_v61 }
 0xab3   :  { %1354 = vmatprep.subr.mxu0 %v2579_v21 }
 0xab4   :  { %1355 = vmatpush1.msra.mxu0 %v2585_v23 }
 0xab5   :  { %1356 = vmatprep.subr.mxu0 %v2591_v25 }
 0xab6   :  { %1357 = vmatpush1.msra.mxu0 %v2597_v24 }
 0xab7   :  { %1358 = vmatprep.subr.mxu0 %v2603_v26 }
 0xab8   :  { %1359 = vmatpush1.msra.mxu0 %v2609_v27 }
 0xab9   :  { %1360 = vmatprep.subr.mxu0 %v2615_v63 }
 0xaba   :  { %1361 = vmatpush1.msra.mxu0 %v2621_v62 }
 0xabb   :  { %1362 = vmatprep.subr.mxu0 %v2627_v0 }
 0xabc   :  { %1363 = vmatpush1.msra.mxu0 %v2633_v5 }
 0xabd   :  { %1364 = vmatprep.subr.mxu0 %v2639_v9 }
 0xabe   :  { %1365 = vmatpush1.msra.mxu0 %v2645_v17 }
 0xabf   :  { %1813 = vmatprep.subr.mxu0 %v1986_v3 }
 0xb6f   :  { %v1076_v28 = vpop.f32.mrf.mxu0 }
 0xb70   :  { %v1088_v33 = vadd.f32 %v1076_v28, %v2258_v48  ;;  %1109 = vrot.lane.b32.xlu1 %v1076_v28, %s1988_s3  ;;  %v1081_v7 = vadd.f32 %v1076_v28, %v999_v32 }
 0xb71   :  { %v1078_v36 = vpop.f32.mrf.mxu0 }
 0xb72   :  { %1090 = vrot.lane.b32.xlu0 %v1088_v33, %s1987_s16  ;;  %v1130_v40 = vadd.f32 %v2657_v13, %v1078_v36  ;;  %v1780_v45 = vmul.f32 -1.442695, %v1081_v7 }
 0xb74   :  { %1904 = vpow2.f32 %v1780_v45 }
 0xb76   :  { %237 = vrot.lane.b32.xlu0 %v2276_v59, %s1988_s3  ;;  %v236_v59 = vpop.permute.xlu1 %235 }
 0xb7a   :  { %1132 = vrot.lane.b32.xlu0 %v1130_v40, %s1989_s12 }
 0xb81   :  { %v1905_v22 = vpop.eup %1904 }
 0xb82   :  { %v1085_v39 = vadd.f32 1.0, %v1905_v22 }
 0xb84   :  { %1906 = vrcp.f32 %v1085_v39 }
 0xb91   :  { %v1907_v51 = vpop.eup %1906 }
 0xb92   :  { %v1100_v7 = vsub.f32 1.0, %v1907_v51  ;;  %v1106_v22 = vmul.f32 %v1907_v51, %v2533_v37 }
 0xbe2   :  { %v1110_v2 = vpop.permute.xlu1 %1109 }
 0xbe4   :  { %v1091_v53 = vpop.permute.xlu0 %1090 }
 0xbe5   :  { %v1093_v58 = vmul.f32 %v1907_v51, %v1091_v53 }
 0xbe7   :  { %1095 = vrot.lane.b32.xlu1 %v1093_v58, %s1987_s16 }
 0xbe8   :  { %v238_v38 = vpop.permute.xlu0 %237 }
 0xbe9   :  { %v258_v30 = vsel %vm60_vm0, %v236_v59, %v238_v38 }
 0xbea   :  { %274 = vst.msk [vmem:[#allocation3 + $0x18] sm:$0xff] %vm198_vm1, %v258_v30 }
 0xbec   :  { %v1133_v34 = vpop.permute.xlu0 %1132 }
 0xbf1   :  { %v1001_v54 = vld [vmem:[#allocation3 + $0x18] sm:$0xff] }
 0xbf2   :  { %v1112_v11 = vadd.f32 %v1110_v2, %v1001_v54 }
 0xbf4   :  { %v1781_v4 = vmul.f32 -1.442695, %v1112_v11 }
 0xbf6   :  { %1908 = vpow2.f32 %v1781_v4 }
 0xc03   :  { %v1909_v6 = vpop.eup %1908 }
 0xc04   :  { %v1116_v8 = vadd.f32 1.0, %v1909_v6 }
 0xc06   :  { %1910 = vrcp.f32 %v1116_v8 }
 0xc13   :  { %v1911_v12 = vpop.eup %1910 }
 0xc14   :  { %v1135_v14 = vmul.f32 %v1911_v12, %v1133_v34 }
 0xc16   :  { %1137 = vrot.lane.b32.xlu0 %v1135_v14, %s1987_s16 }
 0xc1a   :  { %1120 = vrot.lane.b32.xlu0 %v1078_v36, %s1988_s3 }
 0xc59   :  { %v1096_v16 = vpop.permute.xlu1 %1095 }
 0xc5a   :  { %v1098_v57 = vadd.f32 %v1096_v16, %v999_v32 }
 0xc5c   :  { %1912 = vtanh.f32 %v1098_v57 }
 0xc69   :  { %v1913_v18 = vpop.eup %1912 }
 0xc6a   :  { %1102 = vrot.lane.b32.xlu1 %v1913_v18, %s1989_s12 }
 0xc88   :  { %v1138_v28 = vpop.permute.xlu0 %1137 }
 0xc89   :  { %v1140_v33 = vadd.f32 %v1138_v28, %v1001_v54 }
 0xc8b   :  { %1914 = vtanh.f32 %v1140_v33 }
 0xc8c   :  { %v1121_v32 = vpop.permute.xlu0 %1120 }
 0xc8d   :  { %v1123_v58 = vadd.f32 %v1121_v32, %v1001_v54 }
 0xc8f   :  { %v1782_v59 = vmul.f32 -1.442695, %v1123_v58 }
 0xc91   :  { %1916 = vpow2.f32 %v1782_v59 }
 0xc98   :  { %v1915_v40 = vpop.eup %1914 }
 0xc99   :  { %1144 = vrot.lane.b32.xlu1 %v1915_v40, %s1989_s12 }
 0xc9e   :  { %v1917_v51 = vpop.eup %1916 }
 0xc9f   :  { %v1127_v38 = vadd.f32 1.0, %v1917_v51 }
 0xca1   :  { %1918 = vrcp.f32 %v1127_v38 }
 0xcae   :  { %v1919_v30 = vpop.eup %1918 }
 0xcaf   :  { %v1142_v11 = vsub.f32 1.0, %v1919_v30 }
 0xcdc   :  { %v1103_v45 = vpop.permute.xlu1 %1102 }
 0xcdd   :  { %v1105_v39 = vmul.f32 %v1103_v45, %v1100_v7 }
 0xcdf   :  { %v2669_v53 = vadd.f32 %v1106_v22, %v1105_v39 }
 0xce1   :  { %v2675_v36 = vsel %vm992_vm9, %v2669_v53, %v2533_v37  ;;  %v1148_v37 = vmul.f32 %v1919_v30, %v2552_v1 }
 0xce2   :  { %1165 = vrot.lane.b32.xlu0 %v2675_v36, %s1989_s12 }
 0xce6   :  { %231 = vrot.lane.b32.xlu0 %v2264_v52, %s1988_s3 }
 0xd0b   :  { %v1145_v2 = vpop.permute.xlu1 %1144 }
 0xd0c   :  { %v1147_v4 = vmul.f32 %v1145_v2, %v1142_v11 }
 0xd0e   :  { %v2682_v6 = vadd.f32 %v1148_v37, %v1147_v4 }
 0xd10   :  { %v2688_v52 = vsel %vm980_vm8, %v2682_v6, %v2552_v1 }
 0xd54   :  { %v1166_v54 = vpop.permute.xlu0 %1165 }
 0xd55   :  { %v1168_v8 = vsel %vm60_vm0, %v1166_v54, %v2688_v52 }
 0xd56   :  { %1785 = vmatmul.mubr.msk.f32.vlgmr.msra.gmra.mxu1 %vm305_vm7, %v1168_v8 }
 0xd57   :  { %1512 = vmatpush1.msra.mxu1 %v2560_v19  ;;  %1559 = vmatprep.mubr.f32.mxu1 %v1986_v3 }
 0xd58   :  { %1513 = vmatprep.subr.mxu1 %v2567_v20 }
 0xd59   :  { %1514 = vmatpush1.msra.mxu1 %v2573_v61 }
 0xd5a   :  { %1515 = vmatprep.subr.mxu1 %v2579_v21  ;;  %v1161_v21 = vld [vmem:[#allocation2 + $0x28] sm:$0xff] }
 0xd5b   :  { %1516 = vmatpush1.msra.mxu1 %v2585_v23 }
 0xd5c   :  { %1517 = vmatprep.subr.mxu1 %v2591_v25 }
 0xd5d   :  { %1518 = vmatpush1.msra.mxu1 %v2597_v24 }
 0xd5e   :  { %1519 = vmatprep.subr.mxu1 %v2603_v26 }
 0xd5f   :  { %1520 = vmatpush1.msra.mxu1 %v2609_v27 }
 0xd60   :  { %1521 = vmatprep.subr.mxu1 %v2615_v63 }
 0xd61   :  { %1522 = vmatpush1.msra.mxu1 %v2621_v62 }
 0xd62   :  { %1523 = vmatprep.subr.mxu1 %v2627_v0  ;;  %v232_v0 = vpop.permute.xlu0 %231 }
 0xd63   :  { %1524 = vmatpush1.msra.mxu1 %v2633_v5 }
 0xd64   :  { %1525 = vmatprep.subr.mxu1 %v2639_v9 }
 0xd65   :  { %1526 = vmatpush1.msra.mxu1 %v2645_v17 }
 0xe16   :  { %v1238_v1 = vpop.f32.mrf.mxu1 }
 0xe17   :  { %v1250_v19 = vadd.f32 %v1238_v1, %v2258_v48  ;;  %1271 = vrot.lane.b32.xlu0 %v1238_v1, %s1988_s3  ;;  %v1243_v23 = vadd.f32 %v1238_v1, %v1161_v21 }
 0xe18   :  { %v1240_v20 = vpop.f32.mrf.mxu1 }
 0xe19   :  { %1252 = vrot.lane.b32.xlu1 %v1250_v19, %s1987_s16  ;;  %v1292_v61 = vadd.f32 %v2657_v13, %v1240_v20  ;;  %v1786_v25 = vmul.f32 -1.442695, %v1243_v23 }
 0xe1b   :  { %1920 = vpow2.f32 %v1786_v25 }
 0xe1d   :  { %233 = vrot.lane.b32.xlu1 %v2269_v55, %s1988_s3 }
 0xe21   :  { %1294 = vrot.lane.b32.xlu1 %v1292_v61, %s1989_s12 }
 0xe28   :  { %v1921_v24 = vpop.eup %1920 }
 0xe29   :  { %v1247_v26 = vadd.f32 1.0, %v1921_v24 }
 0xe2b   :  { %1922 = vrcp.f32 %v1247_v26 }
 0xe38   :  { %v1923_v27 = vpop.eup %1922 }
 0xe39   :  { %v1262_v32 = vsub.f32 1.0, %v1923_v27  ;;  %v1268_v59 = vmul.f32 %v1923_v27, %v2675_v36 }
 0xe89   :  { %v1272_v9 = vpop.permute.xlu0 %1271 }
 0xe8b   :  { %v1253_v63 = vpop.permute.xlu1 %1252 }
 0xe8c   :  { %v1255_v62 = vmul.f32 %v1923_v27, %v1253_v63 }
 0xe8e   :  { %1257 = vrot.lane.b32.xlu0 %v1255_v62, %s1987_s16 }
 0xe8f   :  { %v234_v5 = vpop.permute.xlu1 %233 }
 0xe90   :  { %v257_v55 = vsel %vm60_vm0, %v232_v0, %v234_v5 }
 0xe91   :  { %273 = vst.msk [vmem:[#allocation3 + $0x10] sm:$0xff] %vm198_vm1, %v257_v55 }
 0xe93   :  { %v1295_v18 = vpop.permute.xlu1 %1294 }
 0xe98   :  { %v1163_v17 = vld [vmem:[#allocation3 + $0x10] sm:$0xff] }
 0xe99   :  { %v1274_v12 = vadd.f32 %v1272_v9, %v1163_v17 }
 0xe9b   :  { %v1787_v34 = vmul.f32 -1.442695, %v1274_v12 }
 0xe9d   :  { %1924 = vpow2.f32 %v1787_v34 }
 0xeaa   :  { %v1925_v14 = vpop.eup %1924 }
 0xeab   :  { %v1278_v16 = vadd.f32 1.0, %v1925_v14 }
 0xead   :  { %1926 = vrcp.f32 %v1278_v16 }
 0xeba   :  { %v1927_v57 = vpop.eup %1926 }
 0xebb   :  { %v1297_v28 = vmul.f32 %v1927_v57, %v1295_v18 }
 0xebd   :  { %1299 = vrot.lane.b32.xlu1 %v1297_v28, %s1987_s16 }
 0xec1   :  { %1282 = vrot.lane.b32.xlu1 %v1240_v20, %s1988_s3 }
 0xf00   :  { %v1258_v33 = vpop.permute.xlu0 %1257 }
 0xf01   :  { %v1260_v40 = vadd.f32 %v1258_v33, %v1161_v21 }
 0xf03   :  { %1928 = vtanh.f32 %v1260_v40 }
 0xf10   :  { %v1929_v7 = vpop.eup %1928 }
 0xf11   :  { %1264 = vrot.lane.b32.xlu0 %v1929_v7, %s1989_s12 }
 0xf2f   :  { %v1300_v45 = vpop.permute.xlu1 %1299 }
 0xf30   :  { %v1302_v22 = vadd.f32 %v1300_v45, %v1163_v17 }
 0xf32   :  { %1930 = vtanh.f32 %v1302_v22 }
 0xf33   :  { %v1283_v2 = vpop.permute.xlu1 %1282 }
 0xf34   :  { %v1285_v11 = vadd.f32 %v1283_v2, %v1163_v17 }
 0xf36   :  { %v1788_v4 = vmul.f32 -1.442695, %v1285_v11 }
 0xf38   :  { %1932 = vpow2.f32 %v1788_v4 }
 0xf3f   :  { %v1931_v39 = vpop.eup %1930 }
 0xf40   :  { %1306 = vrot.lane.b32.xlu0 %v1931_v39, %s1989_s12 }
 0xf45   :  { %v1933_v37 = vpop.eup %1932 }
 0xf46   :  { %v1289_v54 = vadd.f32 1.0, %v1933_v37 }
 0xf48   :  { %1934 = vrcp.f32 %v1289_v54 }
 0xf55   :  { %v1935_v8 = vpop.eup %1934 }
 0xf56   :  { %v1304_v19 = vsub.f32 1.0, %v1935_v8 }
 0xf83   :  { %v1265_v58 = vpop.permute.xlu0 %1264 }
 0xf84   :  { %v1267_v51 = vmul.f32 %v1265_v58, %v1262_v32 }
 0xf86   :  { %v2724_v38 = vadd.f32 %v1268_v59, %v1267_v51 }
 0xf88   :  { %v2730_v30 = vsel %vm816_vm15, %v2724_v38, %v2675_v36  ;;  %v1310_v36 = vmul.f32 %v1935_v8, %v2688_v52 }
 0xf89   :  { %1327 = vrot.lane.b32.xlu1 %v2730_v30, %s1989_s12 }
 0xf8d   :  { %227 = vrot.lane.b32.xlu1 %v2256_v46, %s1988_s3 }
 0xfb2   :  { %v1307_v1 = vpop.permute.xlu0 %1306 }
 0xfb3   :  { %v1309_v20 = vmul.f32 %v1307_v1, %v1304_v19 }
 0xfb5   :  { %v2737_v61 = vadd.f32 %v1310_v36, %v1309_v20 }
 0xfb7   :  { %v2743_v46 = vsel %vm804_vm14, %v2737_v61, %v2688_v52  ;;  %v1323_v52 = vld [vmem:[#allocation2 + $0x30] sm:$0xff] }
 0xffb   :  { %v1328_v21 = vpop.permute.xlu1 %1327 }
 0xffc   :  { %v1330_v23 = vsel %vm60_vm0, %v1328_v21, %v2743_v46 }
 0xffd   :  { %1791 = vmatmul.mubr.msk.f32.vlgmr.msra.gmra.mxu0 %vm305_vm7, %v1330_v23 }
 0xfff   :  { %v228_v12 = vpop.permute.xlu1 %227 }
0x10bd   :  { %v1400_v25 = vpop.f32.mrf.mxu0 }
0x10be   :  { %v1412_v24 = vadd.f32 %v1400_v25, %v2258_v48  ;;  %1433 = vrot.lane.b32.xlu1 %v1400_v25, %s1988_s3  ;;  %v1405_v63 = vadd.f32 %v1400_v25, %v1323_v52 }
0x10bf   :  { %v1402_v26 = vpop.f32.mrf.mxu0 }
0x10c0   :  { %1414 = vrot.lane.b32.xlu0 %v1412_v24, %s1987_s16  ;;  %v1454_v27 = vadd.f32 %v2657_v13, %v1402_v26  ;;  %v1792_v62 = vmul.f32 -1.442695, %v1405_v63 }
0x10c2   :  { %1936 = vpow2.f32 %v1792_v62 }
0x10c4   :  { %229 = vrot.lane.b32.xlu0 %v2262_v49, %s1988_s3 }
0x10c8   :  { %1456 = vrot.lane.b32.xlu0 %v1454_v27, %s1989_s12 }
0x10cf   :  { %v1937_v0 = vpop.eup %1936 }
0x10d0   :  { %v1409_v5 = vadd.f32 1.0, %v1937_v0 }
0x10d2   :  { %1938 = vrcp.f32 %v1409_v5 }
0x10df   :  { %v1939_v55 = vpop.eup %1938 }
0x10e0   :  { %v1424_v2 = vsub.f32 1.0, %v1939_v55  ;;  %v1430_v4 = vmul.f32 %v1939_v55, %v2730_v30 }
0x1130   :  { %v1434_v14 = vpop.permute.xlu1 %1433 }
0x1132   :  { %v1415_v9 = vpop.permute.xlu0 %1414 }
0x1133   :  { %v1417_v17 = vmul.f32 %v1939_v55, %v1415_v9  ;;  %v1485_v55 = vld [vmem:[#allocation2 + $0x38] sm:$0xff] }
0x1135   :  { %1419 = vrot.lane.b32.xlu1 %v1417_v17, %s1987_s16 }
0x1136   :  { %v230_v34 = vpop.permute.xlu0 %229 }
0x1137   :  { %v256_v49 = vsel %vm60_vm0, %v228_v12, %v230_v34 }
0x1138   :  { %272 = vst.msk [vmem:[#allocation3 + $0x8] sm:$0xff] %vm198_vm1, %v256_v49 }
0x113a   :  { %v1457_v7 = vpop.permute.xlu0 %1456 }
0x113f   :  { %v1325_v16 = vld [vmem:[#allocation3 + $0x8] sm:$0xff] }
0x1140   :  { %v1436_v57 = vadd.f32 %v1434_v14, %v1325_v16 }
0x1142   :  { %v1793_v18 = vmul.f32 -1.442695, %v1436_v57 }
0x1144   :  { %1940 = vpow2.f32 %v1793_v18 }
0x1151   :  { %v1941_v28 = vpop.eup %1940 }
0x1152   :  { %v1440_v33 = vadd.f32 1.0, %v1941_v28 }
0x1154   :  { %1942 = vrcp.f32 %v1440_v33 }
0x1161   :  { %v1943_v40 = vpop.eup %1942 }
0x1162   :  { %v1459_v45 = vmul.f32 %v1943_v40, %v1457_v7 }
0x1164   :  { %1461 = vrot.lane.b32.xlu0 %v1459_v45, %s1987_s16 }
0x1168   :  { %1444 = vrot.lane.b32.xlu0 %v1402_v26, %s1988_s3 }
0x11a7   :  { %v1420_v22 = vpop.permute.xlu1 %1419 }
0x11a8   :  { %v1422_v39 = vadd.f32 %v1420_v22, %v1323_v52 }
0x11aa   :  { %1944 = vtanh.f32 %v1422_v39 }
0x11b7   :  { %v1945_v32 = vpop.eup %1944 }
0x11b8   :  { %1426 = vrot.lane.b32.xlu1 %v1945_v32, %s1989_s12 }
0x11d6   :  { %v1462_v58 = vpop.permute.xlu0 %1461 }
0x11d7   :  { %v1464_v59 = vadd.f32 %v1462_v58, %v1325_v16 }
0x11d9   :  { %1946 = vtanh.f32 %v1464_v59 }
0x11da   :  { %v1445_v1 = vpop.permute.xlu0 %1444 }
0x11db   :  { %v1447_v19 = vadd.f32 %v1445_v1, %v1325_v16  ;;  %v1655_v1 = vld [vmem:[%s2945_s6 + $0x28] sm:$0xff] }
0x11dd   :  { %v1794_v20 = vmul.f32 -1.442695, %v1447_v19  ;;  %v629_v19 = vsel %vm628_vm10, %v2388_v15, 0.0  ;;  %v981_v15 = vsel %vm980_vm8, %v2526_v60, 0.0  ;;  %v1312_v60 = vsel %vm816_vm15, %v2724_v38, 0.0 }
0x11df   :  { %1948 = vpow2.f32 %v1794_v20  ;;  %v1654_v20 = vld [vmem:[%s2945_s6 + $0x20] sm:$0xff] }
0x11e6   :  { %v1947_v51 = vpop.eup %1946 }
0x11e7   :  { %1468 = vrot.lane.b32.xlu1 %v1947_v51, %s1989_s12 }
0x11ec   :  { %v1949_v36 = vpop.eup %1948 }
0x11ed   :  { %v1451_v21 = vadd.f32 1.0, %v1949_v36  ;;  %v1653_v36 = vld [vmem:[%s2945_s6 + $0x18] sm:$0xff] }
0x11ef   :  { %1950 = vrcp.f32 %v1451_v21  ;;  %v1652_v21 = vld [vmem:[%s2945_s6 + $0x10] sm:$0xff] }
0x11fc   :  { %v1951_v23 = vpop.eup %1950 }
0x11fd   :  { %v1466_v24 = vsub.f32 1.0, %v1951_v23 }
0x122a   :  { %v1427_v11 = vpop.permute.xlu1 %1426 }
0x122b   :  { %v1429_v37 = vmul.f32 %v1427_v11, %v1424_v2 }
0x122d   :  { %v2763_v54 = vadd.f32 %v1430_v4, %v1429_v37  ;;  %v1657_v4 = vld [vmem:[%s2945_s6 + $0x38] sm:$0xff]  ;;  %v1656_v37 = vld [vmem:[%s2945_s6 + $0x30] sm:$0xff] }
0x122e   :  { %1814 = vmatpush3.msra.mxu0 %v1657_v4 }
0x122f   :  { %v2769_v8 = vsel %vm640_vm11, %v2763_v54, %v2730_v30  ;;  %v1472_v30 = vmul.f32 %v1951_v23, %v2743_v46  ;;  %1815 = vmatprep.subr.mxu0 %v1986_v3  ;;  %v1651_v23 = vld [vmem:[%s2945_s6 + $0x8] sm:$0xff]  ;;  %v1474_v56 = vsel %vm640_vm11, %v2763_v54, 0.0  ;;  %v1156_v54 = vsel %vm980_vm8, %v2682_v6, 0.0 }
0x1230   :  { %1488 = vrot.lane.b32.xlu0 %v2769_v8, %s1989_s12  ;;  %1816 = vmatpush3.msra.mxu0 %v1656_v37 }
0x1231   :  { %1817 = vmatprep.subr.mxu0 %v1986_v3 }
0x1232   :  { %1818 = vmatpush3.msra.mxu0 %v1655_v1 }
0x1233   :  { %1819 = vmatprep.subr.mxu0 %v1986_v3 }
0x1234   :  { %223 = vrot.lane.b32.xlu0 %v2250_v41, %s1988_s3  ;;  %1820 = vmatpush3.msra.mxu0 %v1654_v20 }
0x1235   :  { %1821 = vmatprep.subr.mxu0 %v1986_v3 }
0x1236   :  { %1822 = vmatpush3.msra.mxu0 %v1653_v36 }
0x1237   :  { %1823 = vmatprep.subr.mxu0 %v1986_v3 }
0x1238   :  { %1824 = vmatpush3.msra.mxu0 %v1652_v21 }
0x1239   :  { %1825 = vmatprep.subr.mxu0 %v1986_v3 }
0x123a   :  { %1826 = vmatpush3.msra.mxu0 %v1651_v23 }
0x123b   :  { %1827 = vmatprep.subr.mxu0 %v1986_v3 }
0x1259   :  { %v1469_v25 = vpop.permute.xlu1 %1468 }
0x125a   :  { %v1471_v26 = vmul.f32 %v1469_v25, %v1466_v24  ;;  %v1650_v25 = vld [vmem:[%s2945_s6] sm:$0xff] }
0x125b   :  { %1828 = vmatpush3.msra.mxu0 %v1650_v25 }
0x125c   :  { %v2776_v27 = vadd.f32 %v1472_v30, %v1471_v26 }
0x125e   :  { %v2782_v41 = vsel %vm628_vm10, %v2776_v27, %v2743_v46 }
0x12a2   :  { %v1489_v52 = vpop.permute.xlu0 %1488 }
0x12a3   :  { %v1491_v63 = vsel %vm60_vm0, %v1489_v52, %v2782_v41 }
0x12a4   :  { %1797 = vmatmul.mubr.msk.f32.vlgmr.msra.gmra.mxu1 %vm305_vm7, %v1491_v63 }
0x12a6   :  { %v224_v16 = vpop.permute.xlu0 %223 }
0x1364   :  { %v1561_v62 = vpop.f32.mrf.mxu1 }
0x1365   :  { %v1573_v0 = vadd.f32 %v1561_v62, %v2258_v48  ;;  %1594 = vrot.lane.b32.xlu0 %v1561_v62, %s1988_s3  ;;  %v1566_v9 = vadd.f32 %v1561_v62, %v1485_v55 }
0x1366   :  { %v1563_v5 = vpop.f32.mrf.mxu1 }
0x1367   :  { %1575 = vrot.lane.b32.xlu1 %v1573_v0, %s1987_s16  ;;  %v1615_v46 = vadd.f32 %v2657_v13, %v1563_v5  ;;  %v1798_v17 = vmul.f32 -1.442695, %v1566_v9 }
0x1369   :  { %1952 = vpow2.f32 %v1798_v17 }
0x136b   :  { %225 = vrot.lane.b32.xlu1 %v2254_v44, %s1988_s3 }
0x136f   :  { %1617 = vrot.lane.b32.xlu1 %v1615_v46, %s1989_s12  ;;  %v1150_v46 = vsel %vm992_vm9, %v2669_v53, 0.0  ;;  %v1480_v53 = vsel %vm628_vm10, %v2776_v27, 0.0 }
0x1376   :  { %v1953_v12 = vpop.eup %1952 }
0x1377   :  { %v1570_v34 = vadd.f32 1.0, %v1953_v12 }
0x1379   :  { %1954 = vrcp.f32 %v1570_v34 }
0x1386   :  { %v2794_v48 = vpop.eup %1954 }
0x1387   :  { %v1585_v42 = vsub.f32 1.0, %v2794_v48  ;;  %v1591_v26 = vmul.f32 %v2794_v48, %v2769_v8 }
0x13d7   :  { %v1595_v57 = vpop.permute.xlu0 %1594 }
0x13d9   :  { %v1576_v49 = vpop.permute.xlu1 %1575 }
0x13da   :  { %v1578_v14 = vmul.f32 %v2794_v48, %v1576_v49 }
0x13dc   :  { %1580 = vrot.lane.b32.xlu0 %v1578_v14, %s1987_s16 }
0x13dd   :  { %v226_v44 = vpop.permute.xlu1 %225 }
0x13de   :  { %v255_v13 = vsel %vm60_vm0, %v224_v16, %v226_v44  ;;  %v1318_v44 = vsel %vm804_vm14, %v2737_v61, 0.0 }
0x13df   :  { %271 = vst.msk [vmem:[#allocation3] sm:$0xff] %vm198_vm1, %v255_v13  ;;  %vm1991_vm1 = vmmov 0  }
0x13e0   :  { %1829 = vmatprep.mubr.msk.f32.mxu0 %vm1991_vm1, %v1986_v3  ;;  %v805_v3 = vsel %vm804_vm14, %v2457_v43, 0.0 }
0x13e1   :  { %v1618_v22 = vpop.permute.xlu1 %1617 }
0x13e6   :  { %v1486_v18 = vld [vmem:[#allocation3] sm:$0xff] }
0x13e7   :  { %v1597_v28 = vadd.f32 %v1595_v57, %v1486_v18 }
0x13e9   :  { %v1799_v33 = vmul.f32 -1.442695, %v1597_v28 }
0x13eb   :  { %1956 = vpow2.f32 %v1799_v33 }
0x13f8   :  { %v1957_v40 = vpop.eup %1956 }
0x13f9   :  { %v1601_v7 = vadd.f32 1.0, %v1957_v40 }
0x13fb   :  { %1958 = vrcp.f32 %v1601_v7 }
0x1408   :  { %v1959_v45 = vpop.eup %1958 }
0x1409   :  { %v1620_v39 = vmul.f32 %v1959_v45, %v1618_v22 }
0x140b   :  { %1622 = vrot.lane.b32.xlu1 %v1620_v39, %s1987_s16 }
0x140f   :  { %1605 = vrot.lane.b32.xlu1 %v1563_v5, %s1988_s3 }
0x144e   :  { %v1581_v32 = vpop.permute.xlu0 %1580 }
0x144f   :  { %v1583_v58 = vadd.f32 %v1581_v32, %v1485_v55 }
0x1451   :  { %1960 = vtanh.f32 %v1583_v58 }
0x145e   :  { %v1961_v59 = vpop.eup %1960 }
0x145f   :  { %1587 = vrot.lane.b32.xlu0 %v1961_v59, %s1989_s12 }
0x147d   :  { %v1623_v51 = vpop.permute.xlu1 %1622 }
0x147e   :  { %v1625_v2 = vadd.f32 %v1623_v51, %v1486_v18 }
0x1480   :  { %1962 = vtanh.f32 %v1625_v2 }
0x1481   :  { %v1606_v24 = vpop.permute.xlu1 %1605 }
0x1482   :  { %v1608_v52 = vadd.f32 %v1606_v24, %v1486_v18 }
0x1484   :  { %v1800_v5 = vmul.f32 -1.442695, %v1608_v52 }
0x1486   :  { %1964 = vpow2.f32 %v1800_v5 }
0x148d   :  { %v1963_v11 = vpop.eup %1962 }
0x148e   :  { %1629 = vrot.lane.b32.xlu0 %v1963_v11, %s1989_s12 }
0x1492   :  { %631 = vrot.lane.b32.xlu0 %v629_v19, %s1989_s12 }
0x1496   :  { %983 = vrot.lane.b32.xlu0 %v981_v15, %s1989_s12 }
0x149a   :  { %1314 = vrot.lane.b32.xlu0 %v1312_v60, %s1989_s12 }
0x14d1   :  { %v1588_v38 = vpop.permute.xlu0 %1587 }
0x14d2   :  { %v1590_v30 = vmul.f32 %v1588_v38, %v1585_v42 }
0x14d4   :  { %v1592_v63 = vadd.f32 %v1591_v26, %v1590_v30 }
0x14d6   :  { %v1643_v62 = vsel %vm469_vm6, %v1592_v63, %v2769_v8  ;;  %v1635_v0 = vsel %vm469_vm6, %v1592_v63, 0.0  ;;  %v1965_v8 = vpop.eup %1964 }
0x14d7   :  { %1646 = vrot.lane.b32.xlu1 %v1643_v62, %s1989_s12  ;;  %1637 = vrot.lane.b32.xlu0 %v1635_v0, %s1989_s12  ;;  %v1612_v55 = vadd.f32 1.0, %v1965_v8 }
0x14d9   :  { %1966 = vrcp.f32 %v1612_v55 }
0x14db   :  { %807 = vrot.lane.b32.xlu1 %v805_v3, %s1989_s12 }
0x14df   :  { %1152 = vrot.lane.b32.xlu1 %v1150_v46, %s1989_s12 }
0x14e3   :  { %1476 = vrot.lane.b32.xlu1 %v1474_v56, %s1989_s12 }
0x14e6   :  { %v1967_v9 = vpop.eup %1966 }
0x14e7   :  { %v1627_v43 = vsub.f32 1.0, %v1967_v9  ;;  %v1633_v12 = vmul.f32 %v1967_v9, %v2782_v41 }
0x1500   :  { %v1630_v17 = vpop.permute.xlu0 %1629 }
0x1501   :  { %v1632_v34 = vmul.f32 %v1630_v17, %v1627_v43 }
0x1503   :  { %v1634_v48 = vadd.f32 %v1633_v12, %v1632_v34 }
0x1504   :  { %v632_v10 = vpop.permute.xlu0 %631 }
0x1505   :  { %v1641_v50 = vsel %vm458_vm4, %v1634_v48, 0.0  ;;  %1765 = vst.msk [vmem:[%s2944_s8 + $0x8] sm:$0xff] %vm60_vm0, %v632_v10  ;;  %v1644_v47 = vsel %vm458_vm4, %v1634_v48, %v2782_v41 }
0x1506   :  { %1642 = vst.msk [vmem:[%s2944_s8] sm:$0xff] %vm472_vm5, %v1641_v50  ;;  %1796 = vst.msk [vmem:[%s2944_s8 + $0x8] sm:$0xff] %vm472_vm5, %v1480_v53 }
0x1508   :  { %v984_v29 = vpop.permute.xlu0 %983 }
0x1509   :  { %1777 = vst.msk [vmem:[%s2944_s8 + $0x18] sm:$0xff] %vm60_vm0, %v984_v29 }
0x150a   :  { %1784 = vst.msk [vmem:[%s2944_s8 + $0x18] sm:$0xff] %vm472_vm5, %v1156_v54 }
0x150c   :  { %v1315_v27 = vpop.permute.xlu0 %1314 }
0x150d   :  { %1789 = vst.msk [vmem:[%s2944_s8 + $0x28] sm:$0xff] %vm60_vm0, %v1315_v27 }
0x1549   :  { %v1647_v49 = vpop.permute.xlu1 %1646  ;;  %v1638_v6 = vpop.permute.xlu0 %1637 }
0x154a   :  { %v1649_v14 = vsel %vm60_vm0, %v1647_v49, %v1644_v47  ;;  %1801 = vst.msk [vmem:[%s2944_s8 + $0x38] sm:$0xff] %vm60_vm0, %v1638_v6 }
0x154b   :  { %1830 = vmatmul.mubr.msk.f32.vlgmr.msra.gmra.mxu0 %vm305_vm7, %v1649_v14 }
0x154d   :  { %v808_v16 = vpop.permute.xlu1 %807 }
0x154e   :  { %1771 = vst.msk [vmem:[%s2944_s8 + $0x10] sm:$0xff] %vm60_vm0, %v808_v16 }
0x154f   :  { %1790 = vst.msk [vmem:[%s2944_s8 + $0x10] sm:$0xff] %vm472_vm5, %v1318_v44 }
0x1551   :  { %v1153_v35 = vpop.permute.xlu1 %1152 }
0x1552   :  { %1783 = vst.msk [vmem:[%s2944_s8 + $0x20] sm:$0xff] %vm60_vm0, %v1153_v35 }
0x1555   :  { %v1477_v41 = vpop.permute.xlu1 %1476 }
0x1556   :  { %1795 = vst.msk [vmem:[%s2944_s8 + $0x30] sm:$0xff] %vm60_vm0, %v1477_v41 }
0x160b   :  { %v1734_v61 = vpop.f32.mrf.mxu0 }
0x160c   :  { %v1735_v13 = vadd.f32 %v1802_v31, %v1734_v61 }
0x160d   :  { %v1831_v57 = vpop.f32.mrf.mxu0 }
0x160e   :  { %1968 = vtanh.f32 %v1735_v13 }
0x161b   :  { %v1969_v18 = vpop.eup %1968 }
0x161c   :  { %1739 = vst.msk [vmem:[%s2947_s9] sm:$0xff] %vm60_vm0, %v1969_v18 }

</bundles_post_ra>
